<compile_context>
chip_gen: v7x
topology: tpu7x:2x2x1
jax: 0.10.0
libtpu: 0.0.40
codegen_flags: <defaults>
</compile_context>

<pallas_src>
import functools

import jax
import jax.numpy as jnp
from jax.experimental import pallas as pl
from jax.experimental.pallas import tpu as pltpu


def _attn_talking_head_kernel(
    # small per-head params in SMEM (scalar-indexed reads)
    w_l_ref, w_w_ref, b_w_ref,
    # tensors in VMEM (bf16 MXU operands, f32 bias/coefficients)
    x_ref, w_qkv_ref, w_proj_ref, b_proj_ref, coef_a_ref, coef_q_ref,
    # output
    o_ref,
    *, num_heads, head_dim,
):
    TB, N, C = x_ref.shape
    H, D = num_heads, head_dim
    M = TB * N          # tokens handled this grid step
    G = H * TB          # fused (head, batch) axis: g = h*TB + b

    # ---- fused q/k/v projection: one wide MXU matmul (M, C) @ (C, 3C) ------
    x2 = x_ref[...].reshape(M, C)                                   # bf16
    qkv = jnp.dot(x2, w_qkv_ref[...],
                  preferred_element_type=jnp.float32).astype(jnp.bfloat16)

    # ---- head-major (G, N, D) stacks ----------------------------------------
    # The D-wide per-head layout is narrower than a lane tile, so one relayout
    # is unavoidable; it is done exactly once here on the fused projection
    # output (value slices + leading-axis concat, no VMEM store/load).
    def split_heads(col0):
        blocks = [qkv[:, col0 + h * D: col0 + (h + 1) * D].reshape(TB, N, D)
                  for h in range(H)]
        return jnp.concatenate(blocks, axis=0)                      # (G, N, D)

    q3 = split_heads(0)            # 1/sqrt(D) already folded into W_q on host
    k3 = split_heads(C)
    v3 = split_heads(2 * C)

    # ---- raw logits, batched over (head, batch): (G, N, N) f32 --------------
    s = jnp.einsum("gqd,gkd->gqk", q3, k3, preferred_element_type=jnp.float32)

    # ---- talking-head mixing: out[g] = sum_h W[g,h] * stack[h] (+ b[g]) -----
    # Scalar MACs from SMEM (good for small H).  For H >= 8 this should move to
    # the MXU as einsum('gh,h...->g...') since the VALU becomes the binding slot.
    def mix_heads(stack, w_ref, b_ref):
        per_head = [stack[h * TB:(h + 1) * TB] for h in range(H)]   # (TB, N, N)
        outs = []
        for g in range(H):
            acc = w_ref[g, 0] * per_head[0]
            for h in range(1, H):
                acc = acc + w_ref[g, h] * per_head[h]
            if b_ref is not None:
                acc = acc + b_ref[g]
            outs.append(acc)
        return jnp.concatenate(outs, axis=0)                        # (G, N, N)

    # proj_l before softmax; b_l dropped (softmax is shift-invariant per row).
    logits = mix_heads(s, w_l_ref, None)

    # ---- softmax over keys (f32; approx reciprocal -> EUP slot) -------------
    m = jnp.max(logits, axis=-1, keepdims=True)
    e = jnp.exp(logits - m)
    p = e * pl.reciprocal(jnp.sum(e, axis=-1, keepdims=True), approx=True)

    # proj_w after softmax (bias added once on the stacked result).
    a = mix_heads(p, w_w_ref, b_w_ref)                              # (G,N,N) f32

    # ---- GFSA attnscale: A' = (1-2*lamb)*A + 3*lamb*(A@A) -------------------
    # Coefficients arrive pre-broadcast as (G,1,1); single fused VALU pass.
    a16 = a.astype(jnp.bfloat16)
    asq = jnp.einsum("gqk,gkm->gqm", a16, a16, preferred_element_type=jnp.float32)
    f16 = (coef_a_ref[...] * a + coef_q_ref[...] * asq).astype(jnp.bfloat16)

    # ---- attn @ v, then output projection fused over (head, head_dim) -------
    o3 = jnp.einsum("gqk,gkd->gqd", f16, v3,
                    preferred_element_type=jnp.float32).astype(jnp.bfloat16)
    o4 = o3.reshape(H, M, D)         # (h*TB+b, n, d) -> (h, b*N+n, d), consistent
    proj = jnp.einsum("hmd,hdc->hmc", o4, w_proj_ref[...],
                      preferred_element_type=jnp.float32)           # (H, M, C)
    out = jnp.sum(proj, axis=0) + b_proj_ref[...]                   # (M, C) f32
    o_ref[...] = out.reshape(TB, N, C).astype(o_ref.dtype)


def _pick_batch_tile(B, N, target_rows=256, max_rows=1024):
    """Smallest batch tile dividing B that pushes M = TB*N toward `target_rows`
    (full MXU fill on v6e/v7x) without letting the live (G,N,N) stacks blow up."""
    tb = 1
    for cand in range(1, B + 1):
        if B % cand != 0 or cand * N > max_rows:
            continue
        tb = cand
        if cand * N >= target_rows:
            break
    return tb


def attention_talking_head(x, params, num_heads, batch_tile=None):
    B, N, C = x.shape
    H = num_heads
    D = C // H
    scale = D ** (-0.5)

    TB = batch_tile if batch_tile is not None else _pick_batch_tile(B, N)
    assert B % TB == 0
    G = H * TB

    # Host-side parameter prep (outside the hot loop):
    #  - fold the qk scale into the q third of the fused qkv weight,
    #  - reshape W_proj to (H, D, C) so the output projection contracts (h, d)
    #    without rebuilding a concatenated (N, C) buffer in the kernel,
    #  - precompute the GFSA coefficients as (G, 1, 1) broadcasts,
    #  - cast all MXU operands (x, W_qkv, W_proj) to bf16.
    w_qkv = params["w_qkv_t"]
    w_qkv = jnp.concatenate([w_qkv[:, :C] * scale, w_qkv[:, C:]], axis=1)
    w_qkv = w_qkv.astype(jnp.bfloat16)                               # (C, 3C)
    w_proj3 = params["w_proj_t"].reshape(H, D, C).astype(jnp.bfloat16)
    b_proj = params["b_proj"].astype(jnp.float32)                    # (1, C)
    lamb_g = jnp.repeat(params["lamb"].astype(jnp.float32), TB)      # (G,)
    coef_a = (1.0 - 2.0 * lamb_g).reshape(G, 1, 1)
    coef_q = (3.0 * lamb_g).reshape(G, 1, 1)
    x16 = x.astype(jnp.bfloat16)

    kernel = functools.partial(
        _attn_talking_head_kernel, num_heads=H, head_dim=D)

    smem = pl.BlockSpec(memory_space=pltpu.MemorySpace.SMEM)
    grid_spec = pltpu.PrefetchScalarGridSpec(
        num_scalar_prefetch=0,
        grid=(B // TB,),
        in_specs=[
            smem, smem, smem,                                   # W_l, W_w, b_w
            pl.BlockSpec((TB, N, C), lambda b: (b, 0, 0)),      # x tile (bf16)
            pl.BlockSpec((C, 3 * C), lambda b: (0, 0)),         # fused W_qkv
            pl.BlockSpec((H, D, C), lambda b: (0, 0, 0)),       # W_proj (H,D,C)
            pl.BlockSpec((1, C), lambda b: (0, 0)),             # b_proj (f32)
            pl.BlockSpec((G, 1, 1), lambda b: (0, 0, 0)),       # (1 - 2*lamb)
            pl.BlockSpec((G, 1, 1), lambda b: (0, 0, 0)),       # 3*lamb
        ],
        out_specs=pl.BlockSpec((TB, N, C), lambda b: (b, 0, 0)),
    )
    return pl.pallas_call(
        kernel,
        grid_spec=grid_spec,
        # bf16 output halves HBM writeback; accumulation/bias stay f32 in-kernel.
        out_shape=jax.ShapeDtypeStruct((B, N, C), jnp.bfloat16),
        compiler_params=pltpu.CompilerParams(
            dimension_semantics=("parallel",),
            # Raises v5e's 16 MiB scoped default; comfortably under every chip's
            # physical VMEM at these shapes.  For production CaiT shapes on v7x
            # (64 MiB physical) re-derive this from the live (G,N,N) stacks.
            vmem_limit_bytes=32 * 1024 * 1024,
        ),
    )(params["w_l"], params["w_w"], params["b_w"],
      x16, w_qkv, w_proj3, b_proj, coef_a, coef_q)


def reference(x, params, num_heads):
    """Pure-JAX f32 replica of the PyTorch forward (eval mode)."""
    B, N, C = x.shape
    D = C // num_heads
    scale = D ** (-0.5)
    qkv = x @ params["w_qkv_t"]
    qkv = qkv.reshape(B, N, 3, num_heads, D).transpose(2, 0, 3, 1, 4)
    q, k, v = qkv[0] * scale, qkv[1], qkv[2]
    attn = jnp.einsum("bhnd,bhmd->bhnm", q, k)
    attn = jnp.einsum("bhnm,gh->bgnm", attn, params["w_l"]) + params["b_l"][None, :, None, None]
    attn = jax.nn.softmax(attn, axis=-1)
    attn = jnp.einsum("bhnm,gh->bgnm", attn, params["w_w"]) + params["b_w"][None, :, None, None]
    identity = jnp.eye(N, dtype=x.dtype)[None, None]
    reaction = 3.0 * jnp.einsum("bhnm,bhmk->bhnk", attn - identity, attn) + attn
    attn = attn + params["lamb"][None, :, None, None] * reaction
    out = jnp.einsum("bhnm,bhmd->bhnd", attn, v).transpose(0, 2, 1, 3).reshape(B, N, C)
    return out @ params["w_proj_t"] + params["b_proj"]


def init_params(key, dim, num_heads):
    ks = jax.random.split(key, 7)
    s = 0.1
    return {
        # qkv: nn.Linear(dim, 3*dim, bias=False), stored pre-transposed (in, out)
        "w_qkv_t": jax.random.normal(ks[0], (dim, 3 * dim), jnp.float32) * s,
        # proj: nn.Linear(dim, dim), stored pre-transposed (in, out) + bias (1, dim)
        "w_proj_t": jax.random.normal(ks[1], (dim, dim), jnp.float32) * s,
        "b_proj": jax.random.normal(ks[2], (1, dim), jnp.float32) * s,
        # proj_l / proj_w: nn.Linear(num_heads, num_heads), PyTorch (out, in) layout
        "w_l": jax.random.normal(ks[3], (num_heads, num_heads), jnp.float32) * s,
        "b_l": jax.random.normal(ks[4], (num_heads,), jnp.float32) * s,  # reference
        # only; mathematically a no-op inside the kernel (softmax shift invariance)
        "w_w": jax.random.normal(ks[5], (num_heads, num_heads), jnp.float32) * s,
        "b_w": jax.random.normal(ks[6], (num_heads,), jnp.float32) * s,
        # lamb is initialized to zeros in PyTorch; use small nonzero values here
        # so the attnscale path is actually exercised.
        "lamb": jnp.linspace(-0.05, 0.05, num_heads, dtype=jnp.float32),
    }


if __name__ == "__main__":
    B, N, C, H = 2, 8, 32, 4
    key = jax.random.PRNGKey(0)
    kx, kp = jax.random.split(key)
    x = jax.random.normal(kx, (B, N, C), jnp.float32)
    params = init_params(kp, C, H)

    out = attention_talking_head(x, params, H)
    out = jax.block_until_ready(out)

    ref = reference(x, params, H)
    assert out.shape == (B, N, C)
    # bf16 MXU operands / bf16 output with f32 accumulation -> bf16-appropriate
    # tolerance against the f32 reference.
    out_f32 = out.astype(jnp.float32)
    max_err = float(jnp.max(jnp.abs(out_f32 - ref)))
    assert jnp.allclose(out_f32, ref, rtol=3e-2, atol=3e-2), max_err
    print("KERNEL_OK")
</pallas_src>

<mosaic_0001>
module attributes {stable_mosaic.version = 11 : i64} {
  func.func @_attn_talking_head_kernel(%arg0: i32, %arg1: memref<4x4xf32, #tpu.memory_space<smem>>, %arg2: memref<4x4xf32, #tpu.memory_space<smem>>, %arg3: memref<4xf32, #tpu.memory_space<smem>>, %arg4: memref<2x8x32xbf16, #tpu.memory_space<vmem>>, %arg5: memref<32x96xbf16, #tpu.memory_space<vmem>>, %arg6: memref<4x8x32xbf16, #tpu.memory_space<vmem>>, %arg7: memref<1x32xf32, #tpu.memory_space<vmem>>, %arg8: memref<8x1x1xf32, #tpu.memory_space<vmem>>, %arg9: memref<8x1x1xf32, #tpu.memory_space<vmem>>, %arg10: memref<2x8x32xbf16, #tpu.memory_space<vmem>>) attributes {dimension_semantics = [#tpu.dimension_semantics<parallel>], iteration_bounds = array<i64: 1>, scalar_prefetch = 0 : i64, scratch_operands = 0 : i64, tpu.core_type = #tpu.core_type<tc>, window_params = [{transform_indices = @transform_0, window_bounds = array<i64: 4, 4>}, {transform_indices = @transform_1, window_bounds = array<i64: 4, 4>}, {transform_indices = @transform_2, window_bounds = array<i64: 4>}, {transform_indices = @transform_3, window_bounds = array<i64: 2, 8, 32>}, {pipeline_mode = #tpu.pipeline_mode<synchronous>, transform_indices = @transform_4, window_bounds = array<i64: 32, 96>}, {pipeline_mode = #tpu.pipeline_mode<synchronous>, transform_indices = @transform_5, window_bounds = array<i64: 4, 8, 32>}, {pipeline_mode = #tpu.pipeline_mode<synchronous>, transform_indices = @transform_6, window_bounds = array<i64: 1, 32>}, {pipeline_mode = #tpu.pipeline_mode<synchronous>, transform_indices = @transform_7, window_bounds = array<i64: 8, 1, 1>}, {pipeline_mode = #tpu.pipeline_mode<synchronous>, transform_indices = @transform_8, window_bounds = array<i64: 8, 1, 1>}, {transform_indices = @transform_9, window_bounds = array<i64: 2, 8, 32>}]} {
    %c0 = arith.constant 0 : index
    %c0_0 = arith.constant 0 : index
    %c0_1 = arith.constant 0 : index
    %0 = vector.load %arg4[%c0, %c0_0, %c0_1] : memref<2x8x32xbf16, #tpu.memory_space<vmem>>, vector<2x8x32xbf16>
    %1 = vector.shape_cast %0 : vector<2x8x32xbf16> to vector<16x32xbf16>
    %c0_2 = arith.constant 0 : index
    %c0_3 = arith.constant 0 : index
    %2 = vector.load %arg5[%c0_2, %c0_3] : memref<32x96xbf16, #tpu.memory_space<vmem>>, vector<32x96xbf16>
    %cst = arith.constant dense<0.000000e+00> : vector<16x96xf32>
    %3 = tpu.matmul %1, %2, %cst {dimension_numbers = #tpu.dot_dimension_numbers<[1], [0], [0], [1], [0, 0, 1, 1], [], []>} : vector<16x32xbf16>, vector<32x96xbf16>, vector<16x96xf32> -> vector<16x96xf32>
    %4 = arith.truncf %3 : vector<16x96xf32> to vector<16x96xbf16>
    %5 = vector.extract_strided_slice %4 {offsets = [0, 0], sizes = [16, 8], strides = [1, 1]} : vector<16x96xbf16> to vector<16x8xbf16>
    %6 = vector.shape_cast %5 : vector<16x8xbf16> to vector<2x8x8xbf16>
    %7 = vector.extract_strided_slice %4 {offsets = [0, 8], sizes = [16, 8], strides = [1, 1]} : vector<16x96xbf16> to vector<16x8xbf16>
    %8 = vector.shape_cast %7 : vector<16x8xbf16> to vector<2x8x8xbf16>
    %9 = vector.extract_strided_slice %4 {offsets = [0, 16], sizes = [16, 8], strides = [1, 1]} : vector<16x96xbf16> to vector<16x8xbf16>
    %10 = vector.shape_cast %9 : vector<16x8xbf16> to vector<2x8x8xbf16>
    %11 = vector.extract_strided_slice %4 {offsets = [0, 24], sizes = [16, 8], strides = [1, 1]} : vector<16x96xbf16> to vector<16x8xbf16>
    %12 = vector.shape_cast %11 : vector<16x8xbf16> to vector<2x8x8xbf16>
    %13 = tpu.concatenate %6, %8, %10, %12 in 0 : vector<2x8x8xbf16>, vector<2x8x8xbf16>, vector<2x8x8xbf16>, vector<2x8x8xbf16> -> vector<8x8x8xbf16>
    %14 = vector.extract_strided_slice %4 {offsets = [0, 32], sizes = [16, 8], strides = [1, 1]} : vector<16x96xbf16> to vector<16x8xbf16>
    %15 = vector.shape_cast %14 : vector<16x8xbf16> to vector<2x8x8xbf16>
    %16 = vector.extract_strided_slice %4 {offsets = [0, 40], sizes = [16, 8], strides = [1, 1]} : vector<16x96xbf16> to vector<16x8xbf16>
    %17 = vector.shape_cast %16 : vector<16x8xbf16> to vector<2x8x8xbf16>
    %18 = vector.extract_strided_slice %4 {offsets = [0, 48], sizes = [16, 8], strides = [1, 1]} : vector<16x96xbf16> to vector<16x8xbf16>
    %19 = vector.shape_cast %18 : vector<16x8xbf16> to vector<2x8x8xbf16>
    %20 = vector.extract_strided_slice %4 {offsets = [0, 56], sizes = [16, 8], strides = [1, 1]} : vector<16x96xbf16> to vector<16x8xbf16>
    %21 = vector.shape_cast %20 : vector<16x8xbf16> to vector<2x8x8xbf16>
    %22 = tpu.concatenate %15, %17, %19, %21 in 0 : vector<2x8x8xbf16>, vector<2x8x8xbf16>, vector<2x8x8xbf16>, vector<2x8x8xbf16> -> vector<8x8x8xbf16>
    %23 = vector.extract_strided_slice %4 {offsets = [0, 64], sizes = [16, 8], strides = [1, 1]} : vector<16x96xbf16> to vector<16x8xbf16>
    %24 = vector.shape_cast %23 : vector<16x8xbf16> to vector<2x8x8xbf16>
    %25 = vector.extract_strided_slice %4 {offsets = [0, 72], sizes = [16, 8], strides = [1, 1]} : vector<16x96xbf16> to vector<16x8xbf16>
    %26 = vector.shape_cast %25 : vector<16x8xbf16> to vector<2x8x8xbf16>
    %27 = vector.extract_strided_slice %4 {offsets = [0, 80], sizes = [16, 8], strides = [1, 1]} : vector<16x96xbf16> to vector<16x8xbf16>
    %28 = vector.shape_cast %27 : vector<16x8xbf16> to vector<2x8x8xbf16>
    %29 = vector.extract_strided_slice %4 {offsets = [0, 88], sizes = [16, 8], strides = [1, 1]} : vector<16x96xbf16> to vector<16x8xbf16>
    %30 = vector.shape_cast %29 : vector<16x8xbf16> to vector<2x8x8xbf16>
    %31 = tpu.concatenate %24, %26, %28, %30 in 0 : vector<2x8x8xbf16>, vector<2x8x8xbf16>, vector<2x8x8xbf16>, vector<2x8x8xbf16> -> vector<8x8x8xbf16>
    "tpu.trace_start"() <{level = 10 : i32, message = "gqd,gkd->gqk"}> : () -> ()
    %cst_4 = arith.constant dense<0.000000e+00> : vector<8x8x8xf32>
    %32 = tpu.matmul %13, %22, %cst_4 {dimension_numbers = #tpu.dot_dimension_numbers<[2], [2], [1], [1], [0, 0, 0, 1, 1, 1], [0], [0]>} : vector<8x8x8xbf16>, vector<8x8x8xbf16>, vector<8x8x8xf32> -> vector<8x8x8xf32>
    "tpu.trace_stop"() : () -> ()
    %33 = vector.extract_strided_slice %32 {offsets = [0, 0, 0], sizes = [2, 8, 8], strides = [1, 1, 1]} : vector<8x8x8xf32> to vector<2x8x8xf32>
    %34 = vector.extract_strided_slice %32 {offsets = [2, 0, 0], sizes = [2, 8, 8], strides = [1, 1, 1]} : vector<8x8x8xf32> to vector<2x8x8xf32>
    %35 = vector.extract_strided_slice %32 {offsets = [4, 0, 0], sizes = [2, 8, 8], strides = [1, 1, 1]} : vector<8x8x8xf32> to vector<2x8x8xf32>
    %36 = vector.extract_strided_slice %32 {offsets = [6, 0, 0], sizes = [2, 8, 8], strides = [1, 1, 1]} : vector<8x8x8xf32> to vector<2x8x8xf32>
    %c0_5 = arith.constant 0 : index
    %c0_6 = arith.constant 0 : index
    %37 = memref.load %arg1[%c0_5, %c0_6] : memref<4x4xf32, #tpu.memory_space<smem>>
    %38 = vector.broadcast %37 : f32 to vector<2x8x8xf32>
    %39 = arith.mulf %38, %33 : vector<2x8x8xf32>
    %c0_7 = arith.constant 0 : index
    %c1 = arith.constant 1 : index
    %40 = memref.load %arg1[%c0_7, %c1] : memref<4x4xf32, #tpu.memory_space<smem>>
    %41 = vector.broadcast %40 : f32 to vector<2x8x8xf32>
    %42 = arith.mulf %41, %34 : vector<2x8x8xf32>
    %43 = arith.addf %39, %42 : vector<2x8x8xf32>
    %c0_8 = arith.constant 0 : index
    %c2 = arith.constant 2 : index
    %44 = memref.load %arg1[%c0_8, %c2] : memref<4x4xf32, #tpu.memory_space<smem>>
    %45 = vector.broadcast %44 : f32 to vector<2x8x8xf32>
    %46 = arith.mulf %45, %35 : vector<2x8x8xf32>
    %47 = arith.addf %43, %46 : vector<2x8x8xf32>
    %c0_9 = arith.constant 0 : index
    %c3 = arith.constant 3 : index
    %48 = memref.load %arg1[%c0_9, %c3] : memref<4x4xf32, #tpu.memory_space<smem>>
    %49 = vector.broadcast %48 : f32 to vector<2x8x8xf32>
    %50 = arith.mulf %49, %36 : vector<2x8x8xf32>
    %51 = arith.addf %47, %50 : vector<2x8x8xf32>
    %c1_10 = arith.constant 1 : index
    %c0_11 = arith.constant 0 : index
    %52 = memref.load %arg1[%c1_10, %c0_11] : memref<4x4xf32, #tpu.memory_space<smem>>
    %53 = vector.broadcast %52 : f32 to vector<2x8x8xf32>
    %54 = arith.mulf %53, %33 : vector<2x8x8xf32>
    %c1_12 = arith.constant 1 : index
    %c1_13 = arith.constant 1 : index
    %55 = memref.load %arg1[%c1_12, %c1_13] : memref<4x4xf32, #tpu.memory_space<smem>>
    %56 = vector.broadcast %55 : f32 to vector<2x8x8xf32>
    %57 = arith.mulf %56, %34 : vector<2x8x8xf32>
    %58 = arith.addf %54, %57 : vector<2x8x8xf32>
    %c1_14 = arith.constant 1 : index
    %c2_15 = arith.constant 2 : index
    %59 = memref.load %arg1[%c1_14, %c2_15] : memref<4x4xf32, #tpu.memory_space<smem>>
    %60 = vector.broadcast %59 : f32 to vector<2x8x8xf32>
    %61 = arith.mulf %60, %35 : vector<2x8x8xf32>
    %62 = arith.addf %58, %61 : vector<2x8x8xf32>
    %c1_16 = arith.constant 1 : index
    %c3_17 = arith.constant 3 : index
    %63 = memref.load %arg1[%c1_16, %c3_17] : memref<4x4xf32, #tpu.memory_space<smem>>
    %64 = vector.broadcast %63 : f32 to vector<2x8x8xf32>
    %65 = arith.mulf %64, %36 : vector<2x8x8xf32>
    %66 = arith.addf %62, %65 : vector<2x8x8xf32>
    %c2_18 = arith.constant 2 : index
    %c0_19 = arith.constant 0 : index
    %67 = memref.load %arg1[%c2_18, %c0_19] : memref<4x4xf32, #tpu.memory_space<smem>>
    %68 = vector.broadcast %67 : f32 to vector<2x8x8xf32>
    %69 = arith.mulf %68, %33 : vector<2x8x8xf32>
    %c2_20 = arith.constant 2 : index
    %c1_21 = arith.constant 1 : index
    %70 = memref.load %arg1[%c2_20, %c1_21] : memref<4x4xf32, #tpu.memory_space<smem>>
    %71 = vector.broadcast %70 : f32 to vector<2x8x8xf32>
    %72 = arith.mulf %71, %34 : vector<2x8x8xf32>
    %73 = arith.addf %69, %72 : vector<2x8x8xf32>
    %c2_22 = arith.constant 2 : index
    %c2_23 = arith.constant 2 : index
    %74 = memref.load %arg1[%c2_22, %c2_23] : memref<4x4xf32, #tpu.memory_space<smem>>
    %75 = vector.broadcast %74 : f32 to vector<2x8x8xf32>
    %76 = arith.mulf %75, %35 : vector<2x8x8xf32>
    %77 = arith.addf %73, %76 : vector<2x8x8xf32>
    %c2_24 = arith.constant 2 : index
    %c3_25 = arith.constant 3 : index
    %78 = memref.load %arg1[%c2_24, %c3_25] : memref<4x4xf32, #tpu.memory_space<smem>>
    %79 = vector.broadcast %78 : f32 to vector<2x8x8xf32>
    %80 = arith.mulf %79, %36 : vector<2x8x8xf32>
    %81 = arith.addf %77, %80 : vector<2x8x8xf32>
    %c3_26 = arith.constant 3 : index
    %c0_27 = arith.constant 0 : index
    %82 = memref.load %arg1[%c3_26, %c0_27] : memref<4x4xf32, #tpu.memory_space<smem>>
    %83 = vector.broadcast %82 : f32 to vector<2x8x8xf32>
    %84 = arith.mulf %83, %33 : vector<2x8x8xf32>
    %c3_28 = arith.constant 3 : index
    %c1_29 = arith.constant 1 : index
    %85 = memref.load %arg1[%c3_28, %c1_29] : memref<4x4xf32, #tpu.memory_space<smem>>
    %86 = vector.broadcast %85 : f32 to vector<2x8x8xf32>
    %87 = arith.mulf %86, %34 : vector<2x8x8xf32>
    %88 = arith.addf %84, %87 : vector<2x8x8xf32>
    %c3_30 = arith.constant 3 : index
    %c2_31 = arith.constant 2 : index
    %89 = memref.load %arg1[%c3_30, %c2_31] : memref<4x4xf32, #tpu.memory_space<smem>>
    %90 = vector.broadcast %89 : f32 to vector<2x8x8xf32>
    %91 = arith.mulf %90, %35 : vector<2x8x8xf32>
    %92 = arith.addf %88, %91 : vector<2x8x8xf32>
    %c3_32 = arith.constant 3 : index
    %c3_33 = arith.constant 3 : index
    %93 = memref.load %arg1[%c3_32, %c3_33] : memref<4x4xf32, #tpu.memory_space<smem>>
    %94 = vector.broadcast %93 : f32 to vector<2x8x8xf32>
    %95 = arith.mulf %94, %36 : vector<2x8x8xf32>
    %96 = arith.addf %92, %95 : vector<2x8x8xf32>
    %97 = tpu.concatenate %51, %66, %81, %96 in 0 : vector<2x8x8xf32>, vector<2x8x8xf32>, vector<2x8x8xf32>, vector<2x8x8xf32> -> vector<8x8x8xf32>
    %cst_34 = arith.constant dense<0xFF800000> : vector<8x8xf32>
    %98 = vector.multi_reduction <maximumf>, %97, %cst_34 [2] : vector<8x8x8xf32> to vector<8x8xf32>
    %99 = vector.shape_cast %98 : vector<8x8xf32> to vector<8x8x1xf32>
    %100 = vector.broadcast %99 : vector<8x8x1xf32> to vector<8x8x8xf32>
    %101 = arith.subf %97, %100 : vector<8x8x8xf32>
    %102 = math.exp %101 : vector<8x8x8xf32>
    %cst_35 = arith.constant dense<0.000000e+00> : vector<8x8xf32>
    %103 = vector.multi_reduction <add>, %102, %cst_35 [2] : vector<8x8x8xf32> to vector<8x8xf32>
    %104 = vector.shape_cast %103 : vector<8x8xf32> to vector<8x8x1xf32>
    %105 = tpu.reciprocal %104 {approx = true} : vector<8x8x1xf32> -> vector<8x8x1xf32>
    %106 = vector.broadcast %105 : vector<8x8x1xf32> to vector<8x8x8xf32>
    %107 = arith.mulf %102, %106 : vector<8x8x8xf32>
    %108 = vector.extract_strided_slice %107 {offsets = [0, 0, 0], sizes = [2, 8, 8], strides = [1, 1, 1]} : vector<8x8x8xf32> to vector<2x8x8xf32>
    %109 = vector.extract_strided_slice %107 {offsets = [2, 0, 0], sizes = [2, 8, 8], strides = [1, 1, 1]} : vector<8x8x8xf32> to vector<2x8x8xf32>
    %110 = vector.extract_strided_slice %107 {offsets = [4, 0, 0], sizes = [2, 8, 8], strides = [1, 1, 1]} : vector<8x8x8xf32> to vector<2x8x8xf32>
    %111 = vector.extract_strided_slice %107 {offsets = [6, 0, 0], sizes = [2, 8, 8], strides = [1, 1, 1]} : vector<8x8x8xf32> to vector<2x8x8xf32>
    %c0_36 = arith.constant 0 : index
    %c0_37 = arith.constant 0 : index
    %112 = memref.load %arg2[%c0_36, %c0_37] : memref<4x4xf32, #tpu.memory_space<smem>>
    %113 = vector.broadcast %112 : f32 to vector<2x8x8xf32>
    %114 = arith.mulf %113, %108 : vector<2x8x8xf32>
    %c0_38 = arith.constant 0 : index
    %c1_39 = arith.constant 1 : index
    %115 = memref.load %arg2[%c0_38, %c1_39] : memref<4x4xf32, #tpu.memory_space<smem>>
    %116 = vector.broadcast %115 : f32 to vector<2x8x8xf32>
    %117 = arith.mulf %116, %109 : vector<2x8x8xf32>
    %118 = arith.addf %114, %117 : vector<2x8x8xf32>
    %c0_40 = arith.constant 0 : index
    %c2_41 = arith.constant 2 : index
    %119 = memref.load %arg2[%c0_40, %c2_41] : memref<4x4xf32, #tpu.memory_space<smem>>
    %120 = vector.broadcast %119 : f32 to vector<2x8x8xf32>
    %121 = arith.mulf %120, %110 : vector<2x8x8xf32>
    %122 = arith.addf %118, %121 : vector<2x8x8xf32>
    %c0_42 = arith.constant 0 : index
    %c3_43 = arith.constant 3 : index
    %123 = memref.load %arg2[%c0_42, %c3_43] : memref<4x4xf32, #tpu.memory_space<smem>>
    %124 = vector.broadcast %123 : f32 to vector<2x8x8xf32>
    %125 = arith.mulf %124, %111 : vector<2x8x8xf32>
    %126 = arith.addf %122, %125 : vector<2x8x8xf32>
    %c0_44 = arith.constant 0 : index
    %127 = memref.load %arg3[%c0_44] : memref<4xf32, #tpu.memory_space<smem>>
    %128 = vector.broadcast %127 : f32 to vector<2x8x8xf32>
    %129 = arith.addf %126, %128 : vector<2x8x8xf32>
    %c1_45 = arith.constant 1 : index
    %c0_46 = arith.constant 0 : index
    %130 = memref.load %arg2[%c1_45, %c0_46] : memref<4x4xf32, #tpu.memory_space<smem>>
    %131 = vector.broadcast %130 : f32 to vector<2x8x8xf32>
    %132 = arith.mulf %131, %108 : vector<2x8x8xf32>
    %c1_47 = arith.constant 1 : index
    %c1_48 = arith.constant 1 : index
    %133 = memref.load %arg2[%c1_47, %c1_48] : memref<4x4xf32, #tpu.memory_space<smem>>
    %134 = vector.broadcast %133 : f32 to vector<2x8x8xf32>
    %135 = arith.mulf %134, %109 : vector<2x8x8xf32>
    %136 = arith.addf %132, %135 : vector<2x8x8xf32>
    %c1_49 = arith.constant 1 : index
    %c2_50 = arith.constant 2 : index
    %137 = memref.load %arg2[%c1_49, %c2_50] : memref<4x4xf32, #tpu.memory_space<smem>>
    %138 = vector.broadcast %137 : f32 to vector<2x8x8xf32>
    %139 = arith.mulf %138, %110 : vector<2x8x8xf32>
    %140 = arith.addf %136, %139 : vector<2x8x8xf32>
    %c1_51 = arith.constant 1 : index
    %c3_52 = arith.constant 3 : index
    %141 = memref.load %arg2[%c1_51, %c3_52] : memref<4x4xf32, #tpu.memory_space<smem>>
    %142 = vector.broadcast %141 : f32 to vector<2x8x8xf32>
    %143 = arith.mulf %142, %111 : vector<2x8x8xf32>
    %144 = arith.addf %140, %143 : vector<2x8x8xf32>
    %c1_53 = arith.constant 1 : index
    %145 = memref.load %arg3[%c1_53] : memref<4xf32, #tpu.memory_space<smem>>
    %146 = vector.broadcast %145 : f32 to vector<2x8x8xf32>
    %147 = arith.addf %144, %146 : vector<2x8x8xf32>
    %c2_54 = arith.constant 2 : index
    %c0_55 = arith.constant 0 : index
    %148 = memref.load %arg2[%c2_54, %c0_55] : memref<4x4xf32, #tpu.memory_space<smem>>
    %149 = vector.broadcast %148 : f32 to vector<2x8x8xf32>
    %150 = arith.mulf %149, %108 : vector<2x8x8xf32>
    %c2_56 = arith.constant 2 : index
    %c1_57 = arith.constant 1 : index
    %151 = memref.load %arg2[%c2_56, %c1_57] : memref<4x4xf32, #tpu.memory_space<smem>>
    %152 = vector.broadcast %151 : f32 to vector<2x8x8xf32>
    %153 = arith.mulf %152, %109 : vector<2x8x8xf32>
    %154 = arith.addf %150, %153 : vector<2x8x8xf32>
    %c2_58 = arith.constant 2 : index
    %c2_59 = arith.constant 2 : index
    %155 = memref.load %arg2[%c2_58, %c2_59] : memref<4x4xf32, #tpu.memory_space<smem>>
    %156 = vector.broadcast %155 : f32 to vector<2x8x8xf32>
    %157 = arith.mulf %156, %110 : vector<2x8x8xf32>
    %158 = arith.addf %154, %157 : vector<2x8x8xf32>
    %c2_60 = arith.constant 2 : index
    %c3_61 = arith.constant 3 : index
    %159 = memref.load %arg2[%c2_60, %c3_61] : memref<4x4xf32, #tpu.memory_space<smem>>
    %160 = vector.broadcast %159 : f32 to vector<2x8x8xf32>
    %161 = arith.mulf %160, %111 : vector<2x8x8xf32>
    %162 = arith.addf %158, %161 : vector<2x8x8xf32>
    %c2_62 = arith.constant 2 : index
    %163 = memref.load %arg3[%c2_62] : memref<4xf32, #tpu.memory_space<smem>>
    %164 = vector.broadcast %163 : f32 to vector<2x8x8xf32>
    %165 = arith.addf %162, %164 : vector<2x8x8xf32>
    %c3_63 = arith.constant 3 : index
    %c0_64 = arith.constant 0 : index
    %166 = memref.load %arg2[%c3_63, %c0_64] : memref<4x4xf32, #tpu.memory_space<smem>>
    %167 = vector.broadcast %166 : f32 to vector<2x8x8xf32>
    %168 = arith.mulf %167, %108 : vector<2x8x8xf32>
    %c3_65 = arith.constant 3 : index
    %c1_66 = arith.constant 1 : index
    %169 = memref.load %arg2[%c3_65, %c1_66] : memref<4x4xf32, #tpu.memory_space<smem>>
    %170 = vector.broadcast %169 : f32 to vector<2x8x8xf32>
    %171 = arith.mulf %170, %109 : vector<2x8x8xf32>
    %172 = arith.addf %168, %171 : vector<2x8x8xf32>
    %c3_67 = arith.constant 3 : index
    %c2_68 = arith.constant 2 : index
    %173 = memref.load %arg2[%c3_67, %c2_68] : memref<4x4xf32, #tpu.memory_space<smem>>
    %174 = vector.broadcast %173 : f32 to vector<2x8x8xf32>
    %175 = arith.mulf %174, %110 : vector<2x8x8xf32>
    %176 = arith.addf %172, %175 : vector<2x8x8xf32>
    %c3_69 = arith.constant 3 : index
    %c3_70 = arith.constant 3 : index
    %177 = memref.load %arg2[%c3_69, %c3_70] : memref<4x4xf32, #tpu.memory_space<smem>>
    %178 = vector.broadcast %177 : f32 to vector<2x8x8xf32>
    %179 = arith.mulf %178, %111 : vector<2x8x8xf32>
    %180 = arith.addf %176, %179 : vector<2x8x8xf32>
    %c3_71 = arith.constant 3 : index
    %181 = memref.load %arg3[%c3_71] : memref<4xf32, #tpu.memory_space<smem>>
    %182 = vector.broadcast %181 : f32 to vector<2x8x8xf32>
    %183 = arith.addf %180, %182 : vector<2x8x8xf32>
    %184 = tpu.concatenate %129, %147, %165, %183 in 0 : vector<2x8x8xf32>, vector<2x8x8xf32>, vector<2x8x8xf32>, vector<2x8x8xf32> -> vector<8x8x8xf32>
    %185 = arith.truncf %184 : vector<8x8x8xf32> to vector<8x8x8xbf16>
    "tpu.trace_start"() <{level = 10 : i32, message = "gqk,gkm->gqm"}> : () -> ()
    %cst_72 = arith.constant dense<0.000000e+00> : vector<8x8x8xf32>
    %186 = tpu.matmul %185, %185, %cst_72 {dimension_numbers = #tpu.dot_dimension_numbers<[2], [1], [1], [2], [0, 0, 0, 1, 1, 2], [0], [0]>} : vector<8x8x8xbf16>, vector<8x8x8xbf16>, vector<8x8x8xf32> -> vector<8x8x8xf32>
    "tpu.trace_stop"() : () -> ()
    %c0_73 = arith.constant 0 : index
    %c0_74 = arith.constant 0 : index
    %c0_75 = arith.constant 0 : index
    %187 = vector.load %arg8[%c0_73, %c0_74, %c0_75] : memref<8x1x1xf32, #tpu.memory_space<vmem>>, vector<8x1x1xf32>
    %188 = vector.broadcast %187 : vector<8x1x1xf32> to vector<8x8x8xf32>
    %189 = arith.mulf %188, %184 : vector<8x8x8xf32>
    %c0_76 = arith.constant 0 : index
    %c0_77 = arith.constant 0 : index
    %c0_78 = arith.constant 0 : index
    %190 = vector.load %arg9[%c0_76, %c0_77, %c0_78] : memref<8x1x1xf32, #tpu.memory_space<vmem>>, vector<8x1x1xf32>
    %191 = vector.broadcast %190 : vector<8x1x1xf32> to vector<8x8x8xf32>
    %192 = arith.mulf %191, %186 : vector<8x8x8xf32>
    %193 = arith.addf %189, %192 : vector<8x8x8xf32>
    %194 = arith.truncf %193 : vector<8x8x8xf32> to vector<8x8x8xbf16>
    "tpu.trace_start"() <{level = 10 : i32, message = "gqk,gkd->gqd"}> : () -> ()
    %cst_79 = arith.constant dense<0.000000e+00> : vector<8x8x8xf32>
    %195 = tpu.matmul %194, %31, %cst_79 {dimension_numbers = #tpu.dot_dimension_numbers<[2], [1], [1], [2], [0, 0, 0, 1, 1, 2], [0], [0]>} : vector<8x8x8xbf16>, vector<8x8x8xbf16>, vector<8x8x8xf32> -> vector<8x8x8xf32>
    "tpu.trace_stop"() : () -> ()
    %196 = arith.truncf %195 : vector<8x8x8xf32> to vector<8x8x8xbf16>
    %197 = vector.shape_cast %196 : vector<8x8x8xbf16> to vector<4x16x8xbf16>
    %c0_80 = arith.constant 0 : index
    %c0_81 = arith.constant 0 : index
    %c0_82 = arith.constant 0 : index
    %198 = vector.load %arg6[%c0_80, %c0_81, %c0_82] : memref<4x8x32xbf16, #tpu.memory_space<vmem>>, vector<4x8x32xbf16>
    "tpu.trace_start"() <{level = 10 : i32, message = "hmd,hdc->hmc"}> : () -> ()
    %cst_83 = arith.constant dense<0.000000e+00> : vector<4x16x32xf32>
    %199 = tpu.matmul %197, %198, %cst_83 {dimension_numbers = #tpu.dot_dimension_numbers<[2], [1], [1], [2], [0, 0, 0, 1, 1, 2], [0], [0]>} : vector<4x16x8xbf16>, vector<4x8x32xbf16>, vector<4x16x32xf32> -> vector<4x16x32xf32>
    "tpu.trace_stop"() : () -> ()
    %cst_84 = arith.constant dense<0.000000e+00> : vector<16x32xf32>
    %200 = vector.multi_reduction <add>, %199, %cst_84 [0] : vector<4x16x32xf32> to vector<16x32xf32>
    %c0_85 = arith.constant 0 : index
    %c0_86 = arith.constant 0 : index
    %201 = vector.load %arg7[%c0_85, %c0_86] : memref<1x32xf32, #tpu.memory_space<vmem>>, vector<1x32xf32>
    %202 = vector.broadcast %201 : vector<1x32xf32> to vector<16x32xf32>
    %203 = arith.addf %200, %202 : vector<16x32xf32>
    %204 = vector.shape_cast %203 : vector<16x32xf32> to vector<2x8x32xf32>
    %205 = arith.truncf %204 : vector<2x8x32xf32> to vector<2x8x32xbf16>
    %c0_87 = arith.constant 0 : index
    %c0_88 = arith.constant 0 : index
    %c0_89 = arith.constant 0 : index
    %206 = vector.load %arg10[%c0_87, %c0_88, %c0_89] : memref<2x8x32xbf16, #tpu.memory_space<vmem>>, vector<2x8x32xbf16>
    tpu.vector_store %arg10[%c0_87, %c0_88, %c0_89], %205 {strides = array<i32>} : memref<2x8x32xbf16, #tpu.memory_space<vmem>>, vector<2x8x32xbf16>,
    return
  }
  func.func @transform_0(%arg0: i32) -> (i32, i32) {
    %c0_i32 = arith.constant 0 : i32
    %c0_i32_0 = arith.constant 0 : i32
    %c0_i32_1 = arith.constant 0 : i32
    return %c0_i32, %c0_i32_0 : i32, i32
  }
  func.func @transform_1(%arg0: i32) -> (i32, i32) {
    %c0_i32 = arith.constant 0 : i32
    %c0_i32_0 = arith.constant 0 : i32
    %c0_i32_1 = arith.constant 0 : i32
    return %c0_i32, %c0_i32_0 : i32, i32
  }
  func.func @transform_2(%arg0: i32) -> i32 {
    %c0_i32 = arith.constant 0 : i32
    %c0_i32_0 = arith.constant 0 : i32
    return %c0_i32 : i32
  }
  func.func @transform_3(%arg0: i32) -> (i32, i32, i32) {
    %c0_i32 = arith.constant 0 : i32
    %c0_i32_0 = arith.constant 0 : i32
    %c0_i32_1 = arith.constant 0 : i32
    return %arg0, %c0_i32, %c0_i32_0 : i32, i32, i32
  }
  func.func @transform_4(%arg0: i32) -> (i32, i32) {
    %c0_i32 = arith.constant 0 : i32
    %c0_i32_0 = arith.constant 0 : i32
    %c0_i32_1 = arith.constant 0 : i32
    return %c0_i32, %c0_i32_0 : i32, i32
  }
  func.func @transform_5(%arg0: i32) -> (i32, i32, i32) {
    %c0_i32 = arith.constant 0 : i32
    %c0_i32_0 = arith.constant 0 : i32
    %c0_i32_1 = arith.constant 0 : i32
    %c0_i32_2 = arith.constant 0 : i32
    return %c0_i32, %c0_i32_0, %c0_i32_1 : i32, i32, i32
  }
  func.func @transform_6(%arg0: i32) -> (i32, i32) {
    %c0_i32 = arith.constant 0 : i32
    %c0_i32_0 = arith.constant 0 : i32
    %c0_i32_1 = arith.constant 0 : i32
    return %c0_i32, %c0_i32_0 : i32, i32
  }
  func.func @transform_7(%arg0: i32) -> (i32, i32, i32) {
    %c0_i32 = arith.constant 0 : i32
    %c0_i32_0 = arith.constant 0 : i32
    %c0_i32_1 = arith.constant 0 : i32
    %c0_i32_2 = arith.constant 0 : i32
    return %c0_i32, %c0_i32_0, %c0_i32_1 : i32, i32, i32
  }
  func.func @transform_8(%arg0: i32) -> (i32, i32, i32) {
    %c0_i32 = arith.constant 0 : i32
    %c0_i32_0 = arith.constant 0 : i32
    %c0_i32_1 = arith.constant 0 : i32
    %c0_i32_2 = arith.constant 0 : i32
    return %c0_i32, %c0_i32_0, %c0_i32_1 : i32, i32, i32
  }
  func.func @transform_9(%arg0: i32) -> (i32, i32, i32) {
    %c0_i32 = arith.constant 0 : i32
    %c0_i32_0 = arith.constant 0 : i32
    %c0_i32_1 = arith.constant 0 : i32
    return %arg0, %c0_i32, %c0_i32_0 : i32, i32, i32
  }
}

</mosaic_0001>

<bundles_post_ra>
// kernel: tpu_custom_call.1
= control target key start
LH: loop header
LB: loop body
LE: loop exit
PB: predicated region body
PF: predicated region fallthrough
CT: control target
= control target key end

     0   :  { %14 = vsyncpa [#allocation5], 0  ;;  %s3207_s0 = inlined_call_operand.hbm [shape: f32[4,4], index: 0, kind: input, shape index: {}]   ;;  %s3208_s1 = inlined_call_operand.hbm [shape: f32[4,4], index: 1, kind: input, shape index: {}]   ;;  %s3209_s2 = inlined_call_operand.vmem [shape: f32[4], index: 2, kind: input, shape index: {}]   ;;  %s3210_s3 = inlined_call_operand.hbm [shape: bf16[2,8,32], index: 3, kind: input, shape index: {}]   ;;  %s3211_s4 = inlined_call_operand.vmem [shape: bf16[32,96], index: 4, kind: input, shape index: {}]   ;;  %s3212_s5 = inlined_call_operand.vmem [shape: bf16[4,8,32], index: 5, kind: input, shape index: {}]   ;;  %s3213_s6 = inlined_call_operand.vmem [shape: f32[1,32], index: 6, kind: input, shape index: {}]   ;;  %s3214_s7 = inlined_call_operand.vmem [shape: f32[8,1,1], index: 7, kind: input, shape index: {}]   ;;  %s3215_s8 = inlined_call_operand.vmem [shape: f32[8,1,1], index: 8, kind: input, shape index: {}]   ;;  %s3216_s9 = inlined_call_operand.hbm [shape: bf16[2,8,32], index: 9, kind: output, shape index: {}]  }
   0x1   :  { %15 = vsyncpa [#allocation8], 0 }
   0x2   :  { %16 = vsyncpa [#allocation6], 0 }
   0x3   :  { %17 = vsyncpa [#allocation3], 0 }
   0x4   :  { %18 = vsyncpa [#allocation4], 0  ;;  %s2443_s11 = scalar_lea.hbm %s3207_s0, 64 }
   0x5   :  { %p2444_p0 = scmp.ne.s32.totalorder %s3207_s0, %s2443_s11  ;;  %p2447_p1 = scmp.lt.u32.totalorder %s2443_s11, %s3207_s0 }
   0x7   :  { %p2449_p2 = pnand %p2447_p1, %p2444_p0 }
   0x9   :  { %2452 = shalt.err (!%p2449_p2)
}
   0xa   :  { %s2529_s16 = smov [#allocation2]   ;;  %s2453_s21 = scalar_lea.hbm %s3208_s1, 64 }
   0xb   :  { %26 = dma.hbm_to_smem %s3207_s0, 64, %s2529_s16, [#allocation5]  }
   0xc   :  { %p2454_p3 = scmp.ne.s32.totalorder %s3208_s1, %s2453_s21  ;;  %p2457_p4 = scmp.lt.u32.totalorder %s2453_s21, %s3208_s1 }
   0xe   :  { %p2459_p5 = pnand %p2457_p4, %p2454_p3 }
  0x10   :  { %2462 = shalt.err (!%p2459_p5)
}
  0x11   :  { %s2530_s26 = smov [#allocation7]   ;;  %s41_s30 = sshll.u32 %s3209_s2, 4  ;;  %s42_s30 = int_to_ptr.vmem [resolvable:$true] %s41_s30 }
  0x12   :  { %34 = dma.hbm_to_smem %s3208_s1, 64, %s2530_s26, [#allocation8]  }
  0x13   :  { %s2463_s10 = scalar_lea.vmem %s42_s30, 16  ;;  %p2468_p7 = scmp.lt.s32.totalorder %s42_s30, %s42_s30 }
  0x14   :  { %p2464_p6 = scmp.ne.s32.totalorder %s42_s30, %s2463_s10  ;;  %p2469_p8 = scmp.lt.s32.totalorder %s2463_s10, %s2463_s10 }
  0x16   :  { %p2470_p9 = por %p2469_p8, %p2468_p7 }
  0x18   :  { %p2471_p10 = pnand %p2470_p9, %p2464_p6 }
  0x1a   :  { %2474 = shalt.err (!%p2471_p10)
}
  0x1b   :  { %s2531_s11 = smov [#allocation9]   ;;  %s2532_s12 = smov [#allocation10]  }
  0x1c   :  { %44 = dma.vmem_to_smem %s42_s30, 16, %s2531_s11, [#allocation6]  }
  0x1d   :  { %s50_s13 = sshll.u32 %s2532_s12, 4  ;;  %s2475_s1 = scalar_lea.hbm %s3210_s3, 128  ;;  %s51_s13 = int_to_ptr.vmem [resolvable:$true] %s50_s13 }
  0x1e   :  { %p2476_p11 = scmp.ne.s32.totalorder %s3210_s3, %s2475_s1  ;;  %p2479_p12 = scmp.lt.u32.totalorder %s2475_s1, %s3210_s3 }
  0x20   :  { %p2481_p13 = pnand %p2479_p12, %p2476_p11 }
  0x22   :  { %2484 = shalt.err (!%p2481_p13)
}
  0x23   :  { %s2485_s19 = scalar_lea.vmem %s51_s13, 128  ;;  %p2490_p1 = scmp.lt.s32.totalorder %s51_s13, %s51_s13 }
  0x24   :  { %p2486_p0 = scmp.ne.s32.totalorder %s51_s13, %s2485_s19  ;;  %p2491_p2 = scmp.lt.s32.totalorder %s2485_s19, %s2485_s19 }
  0x26   :  { %p2492_p3 = por %p2491_p2, %p2490_p1 }
  0x28   :  { %p2493_p4 = pnand %p2492_p3, %p2486_p0 }
  0x2a   :  { %2496 = shalt.err (!%p2493_p4)
}
  0x2b   :  { %s2533_s20 = smov 64   ;;  %s2534_s21 = smov 4  }
  0x2c   :  { %56 = dma.hbm_to_vmem [thread:$0]  %s3210_s3, 128, %s51_s13, [#allocation3], %s2533_s20, %s2533_s20, %s2534_s21  }
  0x2d   :  { %2519 = dma.done.wait [#allocation5], 64  }
  0x2e   :  { %2520 = vsyncadd [#allocation5], 4294967232 }
  0x2f   :  { %2521 = dma.done.wait [#allocation8], 64  }
  0x30   :  { %2522 = vsyncadd [#allocation8], 4294967232 }
  0x31   :  { %2523 = dma.done.wait [#allocation6], 16  }
  0x32   :  { %2524 = vsyncadd [#allocation6], 4294967280 }
  0x33   :  { %2525 = dma.done.wait [#allocation3], 128  }
  0x34   :  { %2526 = vsyncadd [#allocation3], 4294967168 }
  0x35   :  { %79 = sfence }
  0x36   :  { %v2408_v0 = vld [vmem:[%s3211_s4] sm:$0xff]   ;;  %v2535_v1 = vmov 0.0   ;;  %v2409_v2 = vld [vmem:[%s3211_s4 + $0x8] sm:$0xff]   ;;  %vm2536_vm0 = vmmov 0   ;;  %vm104_vm1 = vcmask 261120   ;;  %s2537_s4 = smov 112  }
  0x37   :  { %2216 = vmatprep.subr.bf16.mxu0 %v2535_v1  ;;  %2224 = vmatprep.subr.bf16.mxu1 %v2535_v1  ;;  %v2410_v3 = vld [vmem:[#allocation10] sm:$0xff]   ;;  %s2538_s27 = smov 120   ;;  %s2539_s28 = smov 104   ;;  %vm169_vm2 = vcmask 64512   ;;  %vm855_vm3 = vcmask 1043456   ;;  %vm2034_vm4 = vcmask 257024  }
  0x38   :  { %2217 = vmatpush3.bf16.msra.mxu0 %v2408_v0  ;;  %2220 = vmatprep.mubr.msk.bf16.mxu0 %vm2536_vm0, %v2535_v1  ;;  %s2540_s0 = smov 96   ;;  %s2724_s29 = sld [smem:[#allocation2]] }
  0x39   :  { %2218 = vmatprep.subr.bf16.mxu0 %v2535_v1  ;;  %2226 = vmatprep.mubr.msk.bf16.mxu1 %vm2536_vm0, %v2535_v1  ;;  %s2726_s30 = sld [smem:[#allocation2 + $0x80]]  ;;  %s2732_s12 = sld [smem:[#allocation2 + $0x1]] }
  0x3a   :  { %s2728_s10 = sld [smem:[#allocation2 + $0x100]]  ;;  %s2734_s13 = sld [smem:[#allocation2 + $0x81]] }
  0x3b   :  { %s2730_s11 = sld [smem:[#allocation2 + $0x180]]  ;;  %s2736_s14 = sld [smem:[#allocation2 + $0x101]] }
  0x3c   :  { %2219 = vmatpush3.bf16.msra.mxu0 %v2409_v2  ;;  %s2738_s15 = sld [smem:[#allocation2 + $0x181]]  ;;  %s2744_s1 = sld [smem:[#allocation2 + $0x2]] }
  0x3d   :  { %2230 = vmatprep.subr.bf16.mxu0 %v2535_v1  ;;  %s2746_s16 = sld [smem:[#allocation2 + $0x82]]  ;;  %s2756_s18 = sld [smem:[#allocation2 + $0x103]] }
  0x3e   :  { %v565_v46 = vstv %s2724_s29  ;;  %s2752_s17 = sld [smem:[#allocation2 + $0x102]]  ;;  %s2758_s19 = sld [smem:[#allocation2 + $0x3]] }
  0x3f   :  { %2221 = vmatmul.mubr.msk.bf16.vlgmr.msra.gmra.mrb[0].mxu0 %vm104_vm1, %v2410_v3  ;;  %v587_v47 = vstv %s2726_s30  ;;  %v569_v50 = vstv %s2732_s12  ;;  %s2754_s2 = sld [smem:[#allocation2 + $0x182]]  ;;  %s2764_s22 = sld [smem:[#allocation2 + $0x83]] }
  0x40   :  { %2232 = vmatprep.mubr.msk.bf16.mxu0 %vm2536_vm0, %v2535_v1  ;;  %v609_v48 = vstv %s2728_s10  ;;  %v591_v51 = vstv %s2734_s13  ;;  %s2766_s23 = sld [smem:[#allocation2 + $0x183]]  ;;  %s2876_s29 = sld [smem:[#allocation7]] }
  0x41   :  { %v631_v49 = vstv %s2730_s11  ;;  %v613_v52 = vstv %s2736_s14  ;;  %s2880_s30 = sld [smem:[#allocation7 + $0x80]]  ;;  %s2886_s11 = sld [smem:[#allocation7 + $0x101]] }
  0x42   :  { %v635_v53 = vstv %s2738_s15  ;;  %s2884_s10 = sld [smem:[#allocation7 + $0x180]]  ;;  %s2888_s12 = sld [smem:[#allocation7 + $0x81]] }
  0x43   :  { %s2890_s13 = sld [smem:[#allocation7 + $0x2]]  ;;  %s2892_s14 = sld [smem:[#allocation7 + $0x181]] }
  0x44   :  { %s2894_s15 = sld [smem:[#allocation7 + $0x102]]  ;;  %s2977_s24 = sld [smem:[#allocation7 + $0x183]] }
  0x45   :  { %s3004_s25 = sld [smem:[#allocation9 + $0x3]] }
 0x112   :  { %v142_v4 = vpop.f32.mrb[0].mxu0 }
 0x113   :  { %v2652_v5 = vpack.c.bf16 %v142_v4, %v142_v4  ;;  %v2222_v6 = vpop.f32.mrb[1].mxu0 }
 0x114   :  { %v145_v7 = vpop.f32.mrb[2].mxu0 }
 0x115   :  { %159 = vrot.lane.b32.xlu1 %v2652_v5, %s2537_s4  ;;  %155 = vrot.lane.b32.xlu0 %v2652_v5, %s2538_s27  ;;  %v2223_v8 = vpop.f32.mrb[3].mxu0  ;;  %v2656_v9 = vpack.c.bf16 %v145_v7, %v145_v7 }
 0x119   :  { %161 = vrot.lane.b32.xlu1 %v2656_v9, %s2537_s4  ;;  %157 = vrot.lane.b32.xlu0 %v2656_v9, %s2538_s27 }
 0x11d   :  { %165 = vrot.lane.b32.xlu1 %v2656_v9, %s2539_s28  ;;  %163 = vrot.lane.b32.xlu0 %v2652_v5, %s2539_s28 }
 0x121   :  { %216 = vrot.lane.b32.xlu1 %v2656_v9, %s2540_s0  ;;  %167 = vrot.lane.b32.xlu0 %v2652_v5, %s2540_s0 }
 0x187   :  { %v160_v10 = vpop.permute.xlu1 %159  ;;  %v156_v11 = vpop.permute.xlu0 %155 }
 0x188   :  { %v2664_v12 = vcombine.low %v156_v11, %v156_v11  ;;  %v2667_v15 = vcombine.low %v160_v10, %v160_v10 }
 0x18a   :  { %266 = vrot.lane.b32.xlu0 %v2664_v12, %s2540_s0 }
 0x18b   :  { %v162_v13 = vpop.permute.xlu1 %161  ;;  %v158_v14 = vpop.permute.xlu0 %157 }
 0x18c   :  { %v2669_v16 = vcombine.low %v158_v14, %v158_v14  ;;  %v2673_v19 = vcombine.low %v162_v13, %v162_v13 }
 0x18e   :  { %366 = vrot.lane.b32.xlu0 %v2667_v15, %s2540_s0  ;;  %316 = vrot.lane.b32.xlu1 %v2669_v16, %s2540_s0 }
 0x18f   :  { %v166_v17 = vpop.permute.xlu1 %165  ;;  %v164_v18 = vpop.permute.xlu0 %163 }
 0x190   :  { %v2675_v20 = vcombine.low %v164_v18, %v164_v18  ;;  %v2679_v23 = vcombine.low %v166_v17, %v166_v17 }
 0x192   :  { %416 = vrot.lane.b32.xlu1 %v2673_v19, %s2540_s0  ;;  %466 = vrot.lane.b32.xlu0 %v2675_v20, %s2540_s0 }
 0x193   :  { %v217_v21 = vpop.permute.xlu1 %216  ;;  %v168_v22 = vpop.permute.xlu0 %167 }
 0x194   :  { %v222_v24 = vsel %vm169_vm2, %v217_v21, 0  ;;  %v174_v25 = vsel %vm169_vm2, %v168_v22, 0 }
 0x195   :  { %2225 = vmatpush3.bf16.xpose.msra.mxu1 %v174_v25  ;;  %2231 = vmatpush3.bf16.xpose.msra.mxu0 %v222_v24 }
 0x196   :  { %516 = vrot.lane.b32.xlu1 %v2679_v23, %s2540_s0  ;;  %2236 = vmatprep.subr.bf16.mxu1 %v2535_v1 }
 0x197   :  { %2242 = vmatprep.subr.bf16.mxu0 %v2535_v1 }
 0x19c   :  { %2227 = vmatmul.mubr.msk.bf16.vlgmr.msra.gmra.mrb[0].mxu1 %vm169_vm2, %v2652_v5  ;;  %2233 = vmatmul.mubr.msk.bf16.vlgmr.msra.gmra.mrb[4].mxu0 %vm169_vm2, %v2656_v9 }
 0x19d   :  { %2238 = vmatprep.mubr.msk.bf16.mxu1 %vm2536_vm0, %v2535_v1  ;;  %2244 = vmatprep.mubr.msk.bf16.mxu0 %vm2536_vm0, %v2535_v1 }
 0x1fc   :  { %v267_v26 = vpop.permute.xlu0 %266 }
 0x1fd   :  { %v272_v27 = vsel %vm169_vm2, %v267_v26, 0  ;;  %v575_v26 = vstv %s2744_s1  ;;  %s2896_s1 = sld [smem:[#allocation7 + $0x82]] }
 0x1fe   :  { %2237 = vmatpush3.bf16.xpose.msra.mxu1 %v272_v27  ;;  %v597_v27 = vstv %s2746_s16  ;;  %s2898_s16 = sld [smem:[#allocation7 + $0x3]] }
 0x1ff   :  { %2248 = vmatprep.subr.bf16.mxu1 %v2535_v1 }
 0x200   :  { %v317_v28 = vpop.permute.xlu1 %316  ;;  %v367_v30 = vpop.permute.xlu0 %366 }
 0x201   :  { %v322_v29 = vsel %vm169_vm2, %v317_v28, 0  ;;  %v372_v31 = vsel %vm169_vm2, %v367_v30, 0  ;;  %v619_v28 = vstv %s2752_s17  ;;  %s2900_s17 = sld [smem:[#allocation7 + $0x182]] }
 0x202   :  { %2243 = vmatpush3.bf16.xpose.msra.mxu0 %v322_v29  ;;  %v641_v29 = vstv %s2754_s2  ;;  %s2902_s2 = sld [smem:[#allocation7 + $0x103]] }
 0x203   :  { %2254 = vmatprep.subr.bf16.mxu0 %v2535_v1 }
 0x204   :  { %v417_v32 = vpop.permute.xlu1 %416  ;;  %v467_v34 = vpop.permute.xlu0 %466 }
 0x205   :  { %2239 = vmatmul.mubr.msk.bf16.vlgmr.msra.gmra.mrb[4].mxu1 %vm169_vm2, %v156_v11  ;;  %v422_v33 = vsel %vm169_vm2, %v417_v32, 0  ;;  %v472_v35 = vsel %vm169_vm2, %v467_v34, 0 }
 0x206   :  { %2249 = vmatpush3.bf16.xpose.msra.mxu1 %v372_v31  ;;  %2250 = vmatprep.mubr.msk.bf16.mxu1 %vm2536_vm0, %v2535_v1 }
 0x207   :  { %2260 = vmatprep.subr.bf16.mxu1 %v2535_v1 }
 0x208   :  { %v517_v36 = vpop.permute.xlu1 %516 }
 0x209   :  { %2245 = vmatmul.mubr.msk.bf16.vlgmr.msra.gmra.mrb[8].mxu0 %vm169_vm2, %v158_v14  ;;  %v522_v37 = vsel %vm169_vm2, %v517_v36, 0 }
 0x20a   :  { %2255 = vmatpush3.bf16.xpose.msra.mxu0 %v422_v33  ;;  %2256 = vmatprep.mubr.msk.bf16.mxu0 %vm2536_vm0, %v2535_v1 }
 0x20b   :  { %2266 = vmatprep.subr.bf16.mxu0 %v2535_v1 }
 0x20d   :  { %2251 = vmatmul.mubr.msk.bf16.vlgmr.msra.gmra.mrb[8].mxu1 %vm169_vm2, %v160_v10 }
 0x20e   :  { %2261 = vmatpush3.bf16.xpose.msra.mxu1 %v472_v35  ;;  %2262 = vmatprep.mubr.msk.bf16.mxu1 %vm2536_vm0, %v2535_v1 }
 0x20f   :  { %2272 = vmatprep.subr.bf16.mxu1 %v2535_v1 }
 0x211   :  { %2257 = vmatmul.mubr.msk.bf16.vlgmr.msra.gmra.mrb[12].mxu0 %vm169_vm2, %v162_v13 }
 0x212   :  { %2267 = vmatpush3.bf16.xpose.msra.mxu0 %v522_v37  ;;  %2268 = vmatprep.mubr.msk.bf16.mxu0 %vm2536_vm0, %v2535_v1 }
 0x213   :  { %2278 = vmatprep.subr.bf16.mxu0 %v2535_v1 }
 0x215   :  { %2263 = vmatmul.mubr.msk.bf16.vlgmr.msra.gmra.mrb[12].mxu1 %vm169_vm2, %v164_v18 }
 0x216   :  { %2274 = vmatprep.mubr.msk.bf16.mxu1 %vm2536_vm0, %v2535_v1 }
 0x219   :  { %2269 = vmatmul.mubr.msk.bf16.vlgmr.msra.gmra.mrb[16].mxu0 %vm169_vm2, %v166_v17 }
 0x21a   :  { %2280 = vmatprep.mubr.msk.bf16.mxu0 %vm2536_vm0, %v2535_v1 }
 0x26f   :  { %v210_v38 = vpop.f32.mrb[0].mxu1  ;;  %v258_v39 = vpop.f32.mrb[4].mxu0 }
 0x270   :  { %v2228_v40 = vpop.f32.mrb[1].mxu1  ;;  %v2234_v41 = vpop.f32.mrb[5].mxu0  ;;  %v566_v54 = vmul.f32 %v565_v46, %v210_v38  ;;  %v588_v55 = vmul.f32 %v587_v47, %v210_v38  ;;  %v610_v56 = vmul.f32 %v609_v48, %v210_v38  ;;  %v632_v57 = vmul.f32 %v631_v49, %v210_v38 }
 0x271   :  { %v213_v42 = vpop.f32.mrb[2].mxu1  ;;  %v261_v43 = vpop.f32.mrb[6].mxu0  ;;  %v567_v8 = vmul.f32 %v565_v46, %v258_v39  ;;  %v589_v10 = vmul.f32 %v587_v47, %v258_v39  ;;  %v611_v11 = vmul.f32 %v609_v48, %v258_v39  ;;  %v633_v13 = vmul.f32 %v631_v49, %v258_v39 }
 0x272   :  { %v2229_v44 = vpop.f32.mrb[3].mxu1  ;;  %v2235_v45 = vpop.f32.mrb[7].mxu0 }
 0x2d8   :  { %v308_v58 = vpop.f32.mrb[4].mxu1 }
 0x2d9   :  { %v570_v59 = vmul.f32 %v569_v50, %v308_v58  ;;  %v592_v60 = vmul.f32 %v591_v51, %v308_v58  ;;  %v614_v61 = vmul.f32 %v613_v52, %v308_v58  ;;  %v636_v62 = vmul.f32 %v635_v53, %v308_v58  ;;  %v2240_v63 = vpop.f32.mrb[5].mxu1 }
 0x2da   :  { %v311_v0 = vpop.f32.mrb[6].mxu1 }
 0x2db   :  { %v2241_v2 = vpop.f32.mrb[7].mxu1  ;;  %v616_v3 = vadd.f32 %v614_v61, %v610_v56  ;;  %v572_v4 = vadd.f32 %v570_v59, %v566_v54  ;;  %v594_v6 = vadd.f32 %v592_v60, %v588_v55  ;;  %v638_v7 = vadd.f32 %v636_v62, %v632_v57 }
 0x2dc   :  { %v358_v14 = vpop.f32.mrb[8].mxu0  ;;  %v625_v54 = vstv %s2756_s18  ;;  %v581_v55 = vstv %s2758_s19  ;;  %v603_v56 = vstv %s2764_s22  ;;  %v647_v57 = vstv %s2766_s23  ;;  %s2904_s18 = sld [smem:[#allocation7 + $0x83]]  ;;  %s2906_s19 = sld [smem:[#allocation9]] }
 0x2dd   :  { %v571_v17 = vmul.f32 %v569_v50, %v358_v14  ;;  %v593_v18 = vmul.f32 %v591_v51, %v358_v14  ;;  %v615_v21 = vmul.f32 %v613_v52, %v358_v14  ;;  %v637_v22 = vmul.f32 %v635_v53, %v358_v14  ;;  %v2246_v24 = vpop.f32.mrb[9].mxu0  ;;  %s2908_s22 = sld [smem:[#allocation9 + $0x1]]  ;;  %s2972_s23 = sld [smem:[#allocation9 + $0x2]] }
 0x2de   :  { %v361_v25 = vpop.f32.mrb[10].mxu0 }
 0x2df   :  { %v2247_v30 = vpop.f32.mrb[11].mxu0  ;;  %v573_v31 = vadd.f32 %v571_v17, %v567_v8  ;;  %v595_v32 = vadd.f32 %v593_v18, %v589_v10  ;;  %v617_v33 = vadd.f32 %v615_v21, %v611_v11  ;;  %v639_v34 = vadd.f32 %v637_v22, %v633_v13 }
 0x2e0   :  { %v408_v35 = vpop.f32.mrb[8].mxu1 }
 0x2e1   :  { %v576_v36 = vmul.f32 %v575_v26, %v408_v35  ;;  %v598_v37 = vmul.f32 %v597_v27, %v408_v35  ;;  %v620_v38 = vmul.f32 %v619_v28, %v408_v35  ;;  %v642_v39 = vmul.f32 %v641_v29, %v408_v35  ;;  %v2252_v40 = vpop.f32.mrb[9].mxu1 }
 0x2e2   :  { %v411_v41 = vpop.f32.mrb[10].mxu1  ;;  %v2541_v40 = vmov 0  }
 0x2e3   :  { %v2253_v42 = vpop.f32.mrb[11].mxu1  ;;  %v622_v43 = vadd.f32 %v620_v38, %v616_v3  ;;  %v578_v44 = vadd.f32 %v576_v36, %v572_v4  ;;  %v600_v45 = vadd.f32 %v598_v37, %v594_v6  ;;  %v644_v46 = vadd.f32 %v642_v39, %v638_v7  ;;  %2406 = vset.pattern.permute.xlu1 %v2541_v40 }
 0x2e4   :  { %v458_v47 = vpop.f32.mrb[12].mxu0  ;;  %2407 = vset.pattern.permute.xlu0 %v2541_v40 }
 0x2e5   :  { %v577_v48 = vmul.f32 %v575_v26, %v458_v47  ;;  %v599_v49 = vmul.f32 %v597_v27, %v458_v47  ;;  %v621_v50 = vmul.f32 %v619_v28, %v458_v47  ;;  %v643_v51 = vmul.f32 %v641_v29, %v458_v47  ;;  %v2258_v52 = vpop.f32.mrb[13].mxu0 }
 0x2e6   :  { %v461_v53 = vpop.f32.mrb[14].mxu0 }
 0x2e7   :  { %v2259_v58 = vpop.f32.mrb[15].mxu0  ;;  %v579_v59 = vadd.f32 %v577_v48, %v573_v31  ;;  %v601_v60 = vadd.f32 %v599_v49, %v595_v32  ;;  %v623_v61 = vadd.f32 %v621_v50, %v617_v33  ;;  %v645_v62 = vadd.f32 %v643_v51, %v639_v34 }
 0x2e8   :  { %v508_v63 = vpop.f32.mrb[12].mxu1 }
 0x2e9   :  { %v2264_v0 = vpop.f32.mrb[13].mxu1  ;;  %v626_v2 = vmul.f32 %v625_v54, %v508_v63  ;;  %v582_v3 = vmul.f32 %v581_v55, %v508_v63  ;;  %v604_v4 = vmul.f32 %v603_v56, %v508_v63  ;;  %v648_v6 = vmul.f32 %v647_v57, %v508_v63 }
 0x2ea   :  { %v511_v7 = vpop.f32.mrb[14].mxu1 }
 0x2eb   :  { %v2265_v8 = vpop.f32.mrb[15].mxu1  ;;  %v628_v10 = vadd.f32 %v626_v2, %v622_v43  ;;  %v584_v11 = vadd.f32 %v582_v3, %v578_v44  ;;  %v606_v13 = vadd.f32 %v604_v4, %v600_v45  ;;  %v650_v14 = vadd.f32 %v648_v6, %v644_v46 }
 0x2ec   :  { %v558_v17 = vpop.f32.mrb[16].mxu0 }
 0x2ed   :  { %v2270_v18 = vpop.f32.mrb[17].mxu0  ;;  %v664_v21 = vsel %vm169_vm2, %v628_v10, -inf  ;;  %v652_v22 = vsel %vm169_vm2, %v584_v11, -inf  ;;  %v583_v24 = vmul.f32 %v581_v55, %v558_v17  ;;  %v605_v26 = vmul.f32 %v603_v56, %v558_v17 }
 0x2ee   :  { %665 = vmax.xlane.f32.xlu1 %v664_v21  ;;  %653 = vmax.xlane.f32.xlu0 %v652_v22  ;;  %v561_v25 = vpop.f32.mrb[18].mxu0  ;;  %v627_v27 = vmul.f32 %v625_v54, %v558_v17  ;;  %v649_v28 = vmul.f32 %v647_v57, %v558_v17  ;;  %v658_v34 = vsel %vm169_vm2, %v606_v13, -inf  ;;  %v670_v37 = vsel %vm169_vm2, %v650_v14, -inf }
 0x2ef   :  { %v2271_v29 = vpop.f32.mrb[19].mxu0  ;;  %v585_v30 = vadd.f32 %v583_v24, %v579_v59  ;;  %v607_v31 = vadd.f32 %v605_v26, %v601_v60  ;;  %v2118_v26 = vld [vmem:[%s3214_s7] ss:$0 sm:$0xff] }
 0x2f0   :  { %v629_v32 = vadd.f32 %v627_v27, %v623_v61  ;;  %v651_v33 = vadd.f32 %v649_v28, %v645_v62  ;;  %v2126_v27 = vld [vmem:[%s3215_s8] ss:$0 sm:$0xff]  ;;  %v2127_v28 = vld [vmem:[%s3215_s8 + $0x1] ss:$0 sm:$0xff] }
 0x2f1   :  { %v655_v35 = vsel %vm169_vm2, %v585_v30, -inf  ;;  %v661_v36 = vsel %vm169_vm2, %v607_v31, -inf  ;;  %v2119_v29 = vld [vmem:[%s3214_s7 + $0x1] ss:$0 sm:$0xff] }
 0x2f2   :  { %659 = vmax.xlane.f32.xlu0 %v658_v34  ;;  %656 = vmax.xlane.f32.xlu1 %v655_v35  ;;  %v667_v38 = vsel %vm169_vm2, %v629_v32, -inf  ;;  %v673_v39 = vsel %vm169_vm2, %v651_v33, -inf  ;;  %v2128_v34 = vld [vmem:[%s3215_s8 + $0x2] ss:$0 sm:$0xff]  ;;  %v2129_v35 = vld [vmem:[%s3215_s8 + $0x3] ss:$0 sm:$0xff] }
 0x2f6   :  { %662 = vmax.xlane.f32.xlu0 %v661_v36  ;;  %671 = vmax.xlane.f32.xlu1 %v670_v37  ;;  %v2124_v36 = vld [vmem:[%s3214_s7 + $0x6] ss:$0 sm:$0xff] }
 0x2f7   :  { %v2132_v37 = vld [vmem:[%s3215_s8 + $0x6] ss:$0 sm:$0xff] }
 0x2fa   :  { %668 = vmax.xlane.f32.xlu0 %v667_v38  ;;  %v2131_v38 = vld [vmem:[%s3215_s8 + $0x5] ss:$0 sm:$0xff] }
 0x2fe   :  { %674 = vmax.xlane.f32.xlu0 %v673_v39 }
 0x37b   :  { %v666_v41 = vpop.xlane.xlu1 %665  ;;  %v654_v42 = vpop.xlane.xlu0 %653 }
 0x37c   :  { %v676_v43 = vsub.f32 %v584_v11, %v654_v42  ;;  %v680_v45 = vsub.f32 %v628_v10, %v666_v41 }
 0x37e   :  { %v684_v44 = vmul.f32 1.442695, %v676_v43  ;;  %v692_v52 = vmul.f32 1.442695, %v680_v45 }
 0x37f   :  { %v660_v46 = vpop.xlane.xlu0 %659  ;;  %v657_v47 = vpop.xlane.xlu1 %656 }
 0x380   :  { %v678_v48 = vsub.f32 %v606_v13, %v660_v46  ;;  %v677_v49 = vsub.f32 %v585_v30, %v657_v47  ;;  %2411 = vpow2.f32 %v684_v44  ;;  %v2120_v30 = vld [vmem:[%s3214_s7 + $0x2] ss:$0 sm:$0xff]  ;;  %v741_v44 = vstv %s2876_s29 }
 0x382   :  { %v688_v50 = vmul.f32 1.442695, %v678_v48  ;;  %v686_v51 = vmul.f32 1.442695, %v677_v49  ;;  %v767_v48 = vstv %s2880_s30 }
 0x383   :  { %v663_v53 = vpop.xlane.xlu0 %662  ;;  %v672_v54 = vpop.xlane.xlu1 %671 }
 0x384   :  { %2413 = vpow2.f32 %v688_v50  ;;  %v679_v55 = vsub.f32 %v607_v31, %v663_v53  ;;  %v682_v56 = vsub.f32 %v650_v14, %v672_v54  ;;  %v2122_v31 = vld [vmem:[%s3214_s7 + $0x4] ss:$0 sm:$0xff]  ;;  %v819_v53 = vstv %s2884_s10 }
 0x385   :  { %2415 = vpow2.f32 %v686_v51  ;;  %v797_v51 = vstv %s2886_s11 }
 0x386   :  { %v690_v57 = vmul.f32 1.442695, %v679_v55  ;;  %2417 = vpow2.f32 %v692_v52  ;;  %v696_v58 = vmul.f32 1.442695, %v682_v56  ;;  %v771_v52 = vstv %s2888_s12 }
 0x387   :  { %v669_v59 = vpop.xlane.xlu0 %668  ;;  %v751_v56 = vstv %s2890_s13 }
 0x388   :  { %2419 = vpow2.f32 %v690_v57  ;;  %v681_v60 = vsub.f32 %v629_v32, %v669_v59  ;;  %v2121_v32 = vld [vmem:[%s3214_s7 + $0x3] ss:$0 sm:$0xff]  ;;  %v803_v57 = vstv %s2894_s15 }
 0x389   :  { %2421 = vpow2.f32 %v696_v58  ;;  %v823_v58 = vstv %s2892_s14 }
 0x38a   :  { %v694_v61 = vmul.f32 1.442695, %v681_v60  ;;  %v2780_v62 = vpop.eup %2411 }
 0x38b   :  { %v675_v63 = vpop.xlane.xlu0 %674  ;;  %v700_v2 = vsel %vm169_vm2, %v2780_v62, 0.0 }
 0x38c   :  { %2423 = vpow2.f32 %v694_v61  ;;  %v683_v0 = vsub.f32 %v651_v33, %v675_v63  ;;  %701 = vadd.xlane.f32.xlu1 %v700_v2  ;;  %v2130_v33 = vld [vmem:[%s3215_s8 + $0x4] ss:$0 sm:$0xff]  ;;  %v757_v61 = vstv %s2898_s16  ;;  %v829_v2 = vstv %s2900_s17 }
 0x38e   :  { %v2784_v3 = vpop.eup %2413  ;;  %v698_v4 = vmul.f32 1.442695, %v683_v0  ;;  %v777_v0 = vstv %s2896_s1 }
 0x38f   :  { %v2786_v6 = vpop.eup %2415  ;;  %v706_v7 = vsel %vm169_vm2, %v2784_v3, 0.0 }
 0x390   :  { %2425 = vpow2.f32 %v698_v4  ;;  %v703_v8 = vsel %vm169_vm2, %v2786_v6, 0.0  ;;  %v2792_v10 = vpop.eup %2417  ;;  %707 = vadd.xlane.f32.xlu1 %v706_v7 }
 0x391   :  { %704 = vadd.xlane.f32.xlu0 %v703_v8  ;;  %v712_v14 = vsel %vm169_vm2, %v2792_v10, 0.0  ;;  %v763_v8 = vstv %s2906_s19 }
 0x392   :  { %v2794_v11 = vpop.eup %2419 }
 0x393   :  { %v709_v13 = vsel %vm169_vm2, %v2794_v11, 0.0  ;;  %v2800_v17 = vpop.eup %2421 }
 0x394   :  { %713 = vadd.xlane.f32.xlu1 %v712_v14  ;;  %v718_v22 = vsel %vm169_vm2, %v2800_v17, 0.0  ;;  %v783_v14 = vstv %s2904_s18 }
 0x395   :  { %710 = vadd.xlane.f32.xlu0 %v709_v13  ;;  %v809_v13 = vstv %s2902_s2 }
 0x396   :  { %v2802_v18 = vpop.eup %2423 }
 0x397   :  { %v715_v21 = vsel %vm169_vm2, %v2802_v18, 0.0 }
 0x398   :  { %719 = vadd.xlane.f32.xlu1 %v718_v22 }
 0x399   :  { %716 = vadd.xlane.f32.xlu0 %v715_v21 }
 0x39a   :  { %v2808_v24 = vpop.eup %2425 }
 0x39b   :  { %v721_v25 = vsel %vm169_vm2, %v2808_v24, 0.0 }
 0x39d   :  { %722 = vadd.xlane.f32.xlu0 %v721_v25 }
 0x3a9   :  { %1262 = vperm.xlu1 %2406, %v2118_v26  }
 0x3ad   :  { %1350 = vperm.xlu1 %2406, %v2126_v27  }
 0x3b1   :  { %1354 = vperm.xlu1 %2406, %v2127_v28  }
 0x3b3   :  { %1266 = vperm.xlu0 %2407, %v2119_v29  }
 0x3b5   :  { %1270 = vperm.xlu1 %2406, %v2120_v30  }
 0x3b7   :  { %1278 = vperm.xlu0 %2407, %v2122_v31  }
 0x3b9   :  { %1274 = vperm.xlu1 %2406, %v2121_v32  }
 0x3bb   :  { %1366 = vperm.xlu0 %2407, %v2130_v33  }
 0x3bd   :  { %1358 = vperm.xlu1 %2406, %v2128_v34  }
 0x3bf   :  { %1501 = vrot.lane.b32.xlu0 %v2664_v12, %s2533_s20  ;;  %v2123_v12 = vld [vmem:[%s3214_s7 + $0x5] ss:$0 sm:$0xff] }
 0x3c1   :  { %1362 = vperm.xlu1 %2406, %v2129_v35  }
 0x3c3   :  { %1286 = vperm.xlu0 %2407, %v2124_v36  }
 0x3c5   :  { %1405 = vrot.lane.b32.xlu1 %v2652_v5, %s2533_s20  ;;  %v2125_v5 = vld [vmem:[%s3214_s7 + $0x7] ss:$0 sm:$0xff]  ;;  %s2878_s7 = sld [smem:[#allocation7 + $0x100]] }
 0x3c7   :  { %1374 = vperm.xlu0 %2407, %v2132_v37  }
 0x3c9   :  { %1453 = vrot.lane.b32.xlu1 %v2656_v9, %s2533_s20  ;;  %v2133_v9 = vld [vmem:[%s3215_s8 + $0x7] ss:$0 sm:$0xff]  ;;  %s2882_s8 = sld [smem:[#allocation7 + $0x1]] }
 0x3cb   :  { %1597 = vrot.lane.b32.xlu0 %v2667_v15, %s2533_s20  ;;  %v793_v47 = vstv %s2878_s7 }
 0x3cd   :  { %1282 = vperm.xlu1 %2406, %v2123_v12  }
 0x3cf   :  { %1693 = vrot.lane.b32.xlu0 %v2675_v20, %s2533_s20  ;;  %v745_v50 = vstv %s2882_s8  ;;  %s2542_s8 = smov [#allocation11]  }
 0x3d0   :  { %s2042_s10 = sshll.u32 %s2542_s8, 4  ;;  %s2043_s10 = int_to_ptr.vmem [resolvable:$true] %s2042_s10 }
 0x3d1   :  { %1370 = vperm.xlu1 %2406, %v2131_v38   ;;  %s2497_s11 = scalar_lea.vmem %s2043_s10, 128  ;;  %p2502_p6 = scmp.lt.s32.totalorder %s2043_s10, %s2043_s10 }
 0x3d2   :  { %p2498_p5 = scmp.ne.s32.totalorder %s2043_s10, %s2497_s11  ;;  %p2503_p7 = scmp.lt.s32.totalorder %s2497_s11, %s2497_s11 }
 0x3d4   :  { %p2504_p8 = por %p2503_p7, %p2502_p6 }
 0x3d5   :  { %1549 = vrot.lane.b32.xlu1 %v2669_v16, %s2533_s20 }
 0x3d6   :  { %p2505_p9 = pnand %p2504_p8, %p2498_p5 }
 0x3d9   :  { %1290 = vperm.xlu1 %2406, %v2125_v5  }
 0x3dd   :  { %1378 = vperm.xlu1 %2406, %v2133_v9  }
 0x3e1   :  { %1645 = vrot.lane.b32.xlu1 %v2673_v19, %s2533_s20 }
 0x3e5   :  { %1741 = vrot.lane.b32.xlu1 %v2679_v23, %s2533_s20 }
 0x419   :  { %v702_v15 = vpop.xlane.xlu1 %701 }
 0x41a   :  { %2427 = vrcp.f32 %v702_v15 }
 0x41d   :  { %v708_v39 = vpop.xlane.xlu1 %707 }
 0x41e   :  { %v705_v20 = vpop.xlane.xlu0 %704  ;;  %2429 = vrcp.f32 %v708_v39 }
 0x41f   :  { %2431 = vrcp.f32 %v705_v20 }
 0x421   :  { %v714_v40 = vpop.xlane.xlu1 %713 }
 0x422   :  { %v711_v16 = vpop.xlane.xlu0 %710 }
 0x423   :  { %2433 = vrcp.f32 %v711_v16 }
 0x424   :  { %2435 = vrcp.f32 %v714_v40  ;;  %v2428_v41 = vpop.eup %2427 }
 0x425   :  { %v720_v23 = vpop.xlane.xlu1 %719  ;;  %v2923_v55 = vmul.f32 %v2428_v41, %v2780_v62 }
 0x426   :  { %v717_v19 = vpop.xlane.xlu0 %716 }
 0x427   :  { %2437 = vrcp.f32 %v717_v19  ;;  %v742_v22 = vmul.f32 %v741_v44, %v2923_v55  ;;  %v768_v26 = vmul.f32 %v767_v48, %v2923_v55  ;;  %v794_v39 = vmul.f32 %v793_v47, %v2923_v55 }
 0x428   :  { %2439 = vrcp.f32 %v720_v23  ;;  %v2430_v42 = vpop.eup %2429 }
 0x429   :  { %v2911_v45 = vpop.permute.xlu1 %1262  ;;  %v2914_v46 = vmul.f32 %v2430_v42, %v2784_v3  ;;  %v2432_v49 = vpop.eup %2431 }
 0x42a   :  { %v723_v43 = vpop.xlane.xlu0 %722  ;;  %v2937_v3 = vmul.f32 %v2432_v49, %v2786_v6 }
 0x42b   :  { %2441 = vrcp.f32 %v723_v43  ;;  %v746_v4 = vmul.f32 %v745_v50, %v2914_v46  ;;  %v772_v7 = vmul.f32 %v771_v52, %v2914_v46 }
 0x42c   :  { %v743_v33 = vmul.f32 %v741_v44, %v2937_v3  ;;  %v769_v36 = vmul.f32 %v767_v48, %v2937_v3 }
 0x42d   :  { %v2434_v54 = vpop.eup %2433  ;;  %v2932_v63 = vpop.permute.xlu1 %1350  ;;  %v748_v32 = vadd.f32 %v746_v4, %v742_v22  ;;  %v774_v34 = vadd.f32 %v772_v7, %v768_v26 }
 0x42e   :  { %v2436_v59 = vpop.eup %2435  ;;  %v2929_v60 = vmul.f32 %v2434_v54, %v2794_v11  ;;  %v789_v11 = vstv %s2908_s22 }
 0x42f   :  { %v2940_v62 = vmul.f32 %v2436_v59, %v2792_v10 }
 0x430   :  { %v747_v28 = vmul.f32 %v745_v50, %v2929_v60  ;;  %v773_v30 = vmul.f32 %v771_v52, %v2929_v60  ;;  %v799_v19 = vmul.f32 %v797_v51, %v2929_v60 }
 0x431   :  { %v2438_v21 = vpop.eup %2437  ;;  %v752_v25 = vmul.f32 %v751_v56, %v2940_v62  ;;  %v778_v6 = vmul.f32 %v777_v0, %v2940_v62  ;;  %v2956_v29 = vpop.permute.xlu1 %1354  ;;  %v804_v23 = vmul.f32 %v803_v57, %v2940_v62 }
 0x432   :  { %v2440_v27 = vpop.eup %2439  ;;  %v2953_v10 = vmul.f32 %v2438_v21, %v2802_v18  ;;  %v798_v18 = vmul.f32 %v797_v51, %v2914_v46  ;;  %v749_v20 = vadd.f32 %v747_v28, %v743_v33  ;;  %v775_v16 = vadd.f32 %v773_v30, %v769_v36 }
 0x433   :  { %v2960_v31 = vmul.f32 %v2440_v27, %v2800_v17  ;;  %v754_v38 = vadd.f32 %v752_v25, %v748_v32  ;;  %v780_v9 = vadd.f32 %v778_v6, %v774_v34  ;;  %v795_v51 = vmul.f32 %v793_v47, %v2937_v3 }
 0x434   :  { %v753_v35 = vmul.f32 %v751_v56, %v2953_v10  ;;  %v779_v37 = vmul.f32 %v777_v0, %v2953_v10  ;;  %v800_v50 = vadd.f32 %v798_v18, %v794_v39  ;;  %v805_v59 = vmul.f32 %v803_v57, %v2953_v10 }
 0x435   :  { %v2442_v12 = vpop.eup %2441  ;;  %v758_v5 = vmul.f32 %v757_v61, %v2960_v31  ;;  %v784_v17 = vmul.f32 %v783_v14, %v2960_v31  ;;  %v1271_v43 = vpop.permute.xlu1 %1270  ;;  %v810_v52 = vmul.f32 %v809_v13, %v2960_v31  ;;  %v801_v22 = vadd.f32 %v799_v19, %v795_v51 }
 0x436   :  { %v2970_v15 = vmul.f32 %v2442_v12, %v2808_v24  ;;  %v755_v42 = vadd.f32 %v753_v35, %v749_v20  ;;  %v781_v44 = vadd.f32 %v779_v37, %v775_v16  ;;  %v806_v7 = vadd.f32 %v804_v23, %v800_v50 }
 0x437   :  { %v760_v40 = vadd.f32 %v758_v5, %v754_v38  ;;  %v786_v41 = vadd.f32 %v784_v17, %v780_v9  ;;  %v807_v28 = vadd.f32 %v805_v59, %v801_v22  ;;  %v835_v30 = vstv %s2977_s24 }
 0x438   :  { %v759_v24 = vmul.f32 %v757_v61, %v2970_v15  ;;  %v785_v48 = vmul.f32 %v783_v14, %v2970_v15  ;;  %v824_v14 = vmul.f32 %v823_v58, %v2914_v46  ;;  %v811_v25 = vmul.f32 %v809_v13, %v2970_v15 }
 0x439   :  { %v764_v49 = vadd.f32 %v763_v8, %v760_v40  ;;  %v790_v54 = vadd.f32 %v789_v11, %v786_v41  ;;  %v812_v57 = vadd.f32 %v810_v52, %v806_v7  ;;  %v815_v46 = vstv %s2972_s23  ;;  %v1267_v52 = vpop.permute.xlu0 %1266 }
 0x43a   :  { %v761_v56 = vadd.f32 %v759_v24, %v755_v42  ;;  %v787_v0 = vadd.f32 %v785_v48, %v781_v44  ;;  %v830_v32 = vmul.f32 %v829_v2, %v2940_v62  ;;  %v813_v33 = vadd.f32 %v811_v25, %v807_v28 }
 0x43b   :  { %v844_v4 = vpack.c.bf16 %v764_v49, %v764_v49  ;;  %v2989_v61 = vmul.f32 %v2911_v45, %v764_v49  ;;  %v2997_v47 = vmul.f32 %v1271_v43, %v790_v54  ;;  %v846_v26 = vpack.c.bf16 %v790_v54, %v790_v54 }
 0x43c   :  { %v2994_v21 = vadd.f32 %v763_v8, %v761_v56  ;;  %v791_v6 = vadd.f32 %v789_v11, %v787_v0  ;;  %v1275_v8 = vpop.permute.xlu1 %1274  ;;  %v820_v11 = vmul.f32 %v819_v53, %v2923_v55  ;;  %v825_v18 = vmul.f32 %v823_v58, %v2929_v60 }
 0x43d   :  { %v856_v45 = vsel %vm855_vm3, %v844_v4, 0  ;;  %v3019_v36 = vadd.f32 %v815_v46, %v812_v57  ;;  %v946_v37 = vsel %vm855_vm3, %v846_v26, 0  ;;  %v836_v55 = vmul.f32 %v835_v30, %v2960_v31  ;;  %v1279_v54 = vpop.permute.xlu0 %1278 }
 0x43e   :  { %v845_v27 = vpack.c.bf16 %v2994_v21, %v2994_v21  ;;  %2273 = vmatpush3.bf16.msra.mxu1 %v856_v45  ;;  %v3006_v13 = vmul.f32 %v1275_v8, %v791_v6  ;;  %v847_v34 = vpack.c.bf16 %v791_v6, %v791_v6  ;;  %v826_v12 = vadd.f32 %v824_v14, %v820_v11 }
 0x43f   :  { %2284 = vmatprep.subr.bf16.mxu1 %v2535_v1  ;;  %v821_v62 = vmul.f32 %v819_v53, %v2937_v3  ;;  %v831_v38 = vmul.f32 %v829_v2, %v2953_v10  ;;  %v3034_v60 = vadd.f32 %v815_v46, %v813_v33  ;;  %v837_v31 = vmul.f32 %v835_v30, %v2970_v15 }
 0x440   :  { %v901_v35 = vsel %vm855_vm3, %v845_v27, 0  ;;  %v832_v58 = vadd.f32 %v830_v32, %v826_v12  ;;  %v991_v53 = vsel %vm855_vm3, %v847_v34, 0  ;;  %v848_v2 = vpack.c.bf16 %v3019_v36, %v3019_v36  ;;  %v3045_v17 = vpop.permute.xlu1 %1358 }
 0x441   :  { %2275 = vmatmul.mubr.msk.bf16.vlgmr.msra.gmra.mrb[16].mxu1 %vm169_vm2, %v844_v4  ;;  %2279 = vmatpush3.bf16.msra.mxu0 %v901_v35  ;;  %v827_v5 = vadd.f32 %v825_v18, %v821_v62  ;;  %v841_v9 = vstv %s3004_s25  ;;  %v849_v15 = vpack.c.bf16 %v3034_v60, %v3034_v60  ;;  %v1367_v51 = vpop.permute.xlu0 %1366  ;;  %v1294_v28 = vmul.f32 %v1267_v52, %v2994_v21 }
 0x442   :  { %2285 = vmatpush3.bf16.msra.mxu1 %v946_v37  ;;  %2290 = vmatprep.subr.bf16.mxu0 %v2535_v1  ;;  %v838_v3 = vadd.f32 %v836_v55, %v832_v58  ;;  %v1036_v16 = vsel %vm855_vm3, %v848_v2, 0 }
 0x443   :  { %2286 = vmatprep.mubr.msk.bf16.mxu1 %vm2536_vm0, %v2535_v1  ;;  %2296 = vmatprep.subr.bf16.mxu1 %v2535_v1  ;;  %v833_v10 = vadd.f32 %v831_v38, %v827_v5  ;;  %v1081_v19 = vsel %vm855_vm3, %v849_v15, 0 }
 0x444   :  { %2281 = vmatmul.mubr.msk.bf16.vlgmr.msra.gmra.mrb[20].mxu0 %vm169_vm2, %v845_v27  ;;  %v3049_v39 = vadd.f32 %v841_v9, %v838_v3  ;;  %v3062_v41 = vpop.permute.xlu1 %1362 }
 0x445   :  { %2291 = vmatpush3.bf16.msra.mxu0 %v991_v53  ;;  %2292 = vmatprep.mubr.msk.bf16.mxu0 %vm2536_vm0, %v2535_v1  ;;  %v839_v20 = vadd.f32 %v837_v31, %v833_v10  ;;  %v1502_v0 = vpop.permute.xlu0 %1501 }
 0x446   :  { %2302 = vmatprep.subr.bf16.mxu0 %v2535_v1  ;;  %v850_v23 = vpack.c.bf16 %v3049_v39, %v3049_v39 }
 0x447   :  { %v3056_v40 = vadd.f32 %v841_v9, %v839_v20 }
 0x448   :  { %v1126_v24 = vsel %vm855_vm3, %v850_v23, 0  ;;  %v1406_v43 = vpop.permute.xlu1 %1405 }
 0x449   :  { %2287 = vmatmul.mubr.msk.bf16.vlgmr.msra.gmra.mrb[20].mxu1 %vm169_vm2, %v846_v26  ;;  %v851_v42 = vpack.c.bf16 %v3056_v40, %v3056_v40  ;;  %v1411_v48 = vsel %vm855_vm3, %v1406_v43, 0  ;;  %v3093_v7 = vpop.permute.xlu0 %1286 }
 0x44a   :  { %2297 = vmatpush3.bf16.msra.mxu1 %v1036_v16  ;;  %2298 = vmatprep.mubr.msk.bf16.mxu1 %vm2536_vm0, %v2535_v1 }
 0x44b   :  { %2308 = vmatprep.subr.bf16.mxu1 %v2535_v1  ;;  %v1171_v44 = vsel %vm855_vm3, %v851_v42, 0 }
 0x44c   :  { %2293 = vmatmul.mubr.msk.bf16.vlgmr.msra.gmra.mrb[24].mxu0 %vm169_vm2, %v847_v34  ;;  %v1454_v49 = vpop.permute.xlu1 %1453 }
 0x44d   :  { %2303 = vmatpush3.bf16.msra.mxu0 %v1081_v19  ;;  %2304 = vmatprep.mubr.msk.bf16.mxu0 %vm2536_vm0, %v2535_v1  ;;  %v1459_v50 = vsel %vm855_vm3, %v1454_v49, 0  ;;  %v3101_v32 = vpop.permute.xlu0 %1374 }
 0x44e   :  { %2314 = vmatprep.subr.bf16.mxu0 %v2535_v1 }
 0x450   :  { %v3089_v56 = vpop.permute.xlu1 %1282 }
 0x451   :  { %2299 = vmatmul.mubr.msk.bf16.vlgmr.msra.gmra.mrb[24].mxu1 %vm169_vm2, %v848_v2  ;;  %v1598_v58 = vpop.permute.xlu0 %1597 }
 0x452   :  { %2309 = vmatpush3.bf16.msra.mxu1 %v1126_v24  ;;  %2310 = vmatprep.mubr.msk.bf16.mxu1 %vm2536_vm0, %v2535_v1  ;;  %v1603_v9 = vsel %vm855_vm3, %v1598_v58, 0 }
 0x453   :  { %2320 = vmatprep.subr.bf16.mxu1 %v2535_v1 }
 0x454   :  { %2305 = vmatmul.mubr.msk.bf16.vlgmr.msra.gmra.mrb[28].mxu0 %vm169_vm2, %v849_v15  ;;  %v3091_v59 = vpop.permute.xlu1 %1370  ;;  %v1297_v15 = vmul.f32 %v1279_v54, %v3019_v36  ;;  %v1298_v36 = vmul.f32 %v3089_v56, %v3034_v60  ;;  %v1299_v60 = vmul.f32 %v3093_v7, %v3049_v39 }
 0x455   :  { %2315 = vmatpush3.bf16.msra.mxu0 %v1171_v44  ;;  %2316 = vmatprep.mubr.msk.bf16.mxu0 %vm2536_vm0, %v2535_v1  ;;  %v1694_v43 = vpop.permute.xlu0 %1693 }
 0x456   :  { %2326 = vmatprep.subr.bf16.mxu0 %v2535_v1 }
 0x458   :  { %v1550_v4 = vpop.permute.xlu1 %1549 }
 0x459   :  { %2311 = vmatmul.mubr.msk.bf16.vlgmr.msra.gmra.mrb[28].mxu1 %vm169_vm2, %v850_v23  ;;  %v1555_v37 = vsel %vm855_vm3, %v1550_v4, 0 }
 0x45a   :  { %2321 = vmatpush3.bf16.msra.mxu1 %v1411_v48  ;;  %2322 = vmatprep.mubr.msk.bf16.mxu1 %vm2536_vm0, %v2535_v1 }
 0x45b   :  { %2332 = vmatprep.subr.bf16.mxu1 %v2535_v1 }
 0x45c   :  { %2317 = vmatmul.mubr.msk.bf16.vlgmr.msra.gmra.mrb[32].mxu0 %vm169_vm2, %v851_v42  ;;  %v3096_v57 = vpop.permute.xlu1 %1290 }
 0x45d   :  { %2327 = vmatpush3.bf16.msra.mxu0 %v1459_v50  ;;  %2328 = vmatprep.mubr.msk.bf16.mxu0 %vm2536_vm0, %v2535_v1  ;;  %v1300_v39 = vmul.f32 %v3096_v57, %v3056_v40  ;;  %v1797_v40 = vld [vmem:[%s3212_s5] sm:$0xf] }
 0x45e   :  { %2338 = vmatprep.subr.bf16.mxu0 %v2535_v1  ;;  %v1810_v57 = vsel %vm855_vm3, %v1797_v40, 0 }
 0x460   :  { %v3107_v21 = vpop.permute.xlu1 %1378 }
 0x514   :  { %v892_v14 = vpop.f32.mrb[16].mxu1 }
 0x515   :  { %v1381_v22 = vmul.f32 %v2932_v63, %v892_v14  ;;  %v2276_v25 = vpop.f32.mrb[17].mxu1  ;;  %v1507_v63 = vsel %vm855_vm3, %v1502_v0, 0 }
 0x516   :  { %v895_v26 = vpop.f32.mrb[18].mxu1 }
 0x517   :  { %v1389_v6 = vadd.f32 %v1381_v22, %v2989_v61  ;;  %v2277_v45 = vpop.f32.mrb[19].mxu1  ;;  %v937_v27 = vpop.f32.mrb[20].mxu0 }
 0x518   :  { %v1382_v46 = vmul.f32 %v2956_v29, %v937_v27  ;;  %v2282_v8 = vpop.f32.mrb[21].mxu0 }
 0x519   :  { %v1397_v30 = vpack.c.bf16 %v1389_v6, %v1389_v6  ;;  %v940_v11 = vpop.f32.mrb[22].mxu0 }
 0x51a   :  { %v1390_v33 = vadd.f32 %v1382_v46, %v1294_v28  ;;  %v2283_v34 = vpop.f32.mrb[23].mxu0 }
 0x51b   :  { %2323 = vmatmul.mubr.msk.bf16.vlgmr.msra.gmra.mrb[32].mxu1 %vm169_vm2, %v1397_v30 }
 0x51c   :  { %v1398_v35 = vpack.c.bf16 %v1390_v33, %v1390_v33  ;;  %2333 = vmatpush3.bf16.msra.mxu1 %v1507_v63  ;;  %v982_v61 = vpop.f32.mrb[20].mxu1  ;;  %2334 = vmatprep.mubr.msk.bf16.mxu1 %vm2536_vm0, %v2535_v1 }
 0x51d   :  { %v1383_v29 = vmul.f32 %v3045_v17, %v982_v61  ;;  %v2288_v18 = vpop.f32.mrb[21].mxu1  ;;  %2344 = vmatprep.subr.bf16.mxu1 %v2535_v1 }
 0x51e   :  { %v985_v12 = vpop.f32.mrb[22].mxu1  ;;  %2329 = vmatmul.mubr.msk.bf16.vlgmr.msra.gmra.mrb[36].mxu0 %vm169_vm2, %v1398_v35  ;;  %v1799_v35 = vld [vmem:[%s3212_s5 + $0x8] sm:$0xf] }
 0x51f   :  { %v1391_v55 = vadd.f32 %v1383_v29, %v2997_v47  ;;  %v2289_v62 = vpop.f32.mrb[23].mxu1  ;;  %2339 = vmatpush3.bf16.msra.mxu0 %v1555_v37  ;;  %v1027_v38 = vpop.f32.mrb[24].mxu0  ;;  %2340 = vmatprep.mubr.msk.bf16.mxu0 %vm2536_vm0, %v2535_v1  ;;  %v1914_v12 = vsel %vm855_vm3, %v1799_v35, 0 }
 0x520   :  { %v1384_v5 = vmul.f32 %v3062_v41, %v1027_v38  ;;  %v2294_v31 = vpop.f32.mrb[25].mxu0  ;;  %2350 = vmatprep.subr.bf16.mxu0 %v2535_v1  ;;  %v1646_v47 = vpop.permute.xlu1 %1645 }
 0x521   :  { %v1399_v53 = vpack.c.bf16 %v1391_v55, %v1391_v55  ;;  %v1030_v2 = vpop.f32.mrb[26].mxu0 }
 0x522   :  { %v1392_v3 = vadd.f32 %v1384_v5, %v3006_v13  ;;  %v2295_v10 = vpop.f32.mrb[27].mxu0  ;;  %v1651_v13 = vsel %vm855_vm3, %v1646_v47, 0  ;;  %v1800_v5 = vld [vmem:[%s3212_s5 + $0xc] sm:$0xf] }
 0x523   :  { %2335 = vmatmul.mubr.msk.bf16.vlgmr.msra.gmra.mrb[36].mxu1 %vm169_vm2, %v1399_v53 }
 0x524   :  { %v1400_v17 = vpack.c.bf16 %v1392_v3, %v1392_v3  ;;  %2345 = vmatpush3.bf16.msra.mxu1 %v1603_v9  ;;  %v1072_v20 = vpop.f32.mrb[24].mxu1  ;;  %2346 = vmatprep.mubr.msk.bf16.mxu1 %vm2536_vm0, %v2535_v1  ;;  %v1742_v0 = vpop.permute.xlu1 %1741  ;;  %v1966_v9 = vsel %vm855_vm3, %v1800_v5, 0 }
 0x525   :  { %v1385_v16 = vmul.f32 %v1367_v51, %v1072_v20  ;;  %v2300_v19 = vpop.f32.mrb[25].mxu1  ;;  %2356 = vmatprep.subr.bf16.mxu1 %v2535_v1  ;;  %v1699_v51 = vsel %vm855_vm3, %v1694_v43, 0  ;;  %v1747_v22 = vsel %vm855_vm3, %v1742_v0, 0 }
 0x526   :  { %v1075_v23 = vpop.f32.mrb[26].mxu1  ;;  %2341 = vmatmul.mubr.msk.bf16.vlgmr.msra.gmra.mrb[40].mxu0 %vm169_vm2, %v1400_v17 }
 0x527   :  { %v1393_v41 = vadd.f32 %v1385_v16, %v1297_v15  ;;  %v2301_v42 = vpop.f32.mrb[27].mxu1  ;;  %2351 = vmatpush3.bf16.msra.mxu0 %v1651_v13  ;;  %v1117_v24 = vpop.f32.mrb[28].mxu0  ;;  %2352 = vmatprep.mubr.msk.bf16.mxu0 %vm2536_vm0, %v2535_v1 }
 0x528   :  { %v1386_v44 = vmul.f32 %v3091_v59, %v1117_v24  ;;  %v2306_v48 = vpop.f32.mrb[29].mxu0  ;;  %2362 = vmatprep.subr.bf16.mxu0 %v2535_v1 }
 0x529   :  { %v1401_v49 = vpack.c.bf16 %v1393_v41, %v1393_v41  ;;  %v1120_v50 = vpop.f32.mrb[30].mxu0 }
 0x52a   :  { %v1394_v52 = vadd.f32 %v1386_v44, %v1298_v36  ;;  %v2307_v54 = vpop.f32.mrb[31].mxu0 }
 0x52b   :  { %2347 = vmatmul.mubr.msk.bf16.vlgmr.msra.gmra.mrb[40].mxu1 %vm169_vm2, %v1401_v49 }
 0x52c   :  { %v1402_v4 = vpack.c.bf16 %v1394_v52, %v1394_v52  ;;  %2357 = vmatpush3.bf16.msra.mxu1 %v1699_v51  ;;  %v1162_v14 = vpop.f32.mrb[28].mxu1  ;;  %2358 = vmatprep.mubr.msk.bf16.mxu1 %vm2536_vm0, %v2535_v1 }
 0x52d   :  { %v1387_v56 = vmul.f32 %v3101_v32, %v1162_v14  ;;  %v2312_v59 = vpop.f32.mrb[29].mxu1  ;;  %2368 = vmatprep.subr.bf16.mxu1 %v2535_v1  ;;  %v1798_v32 = vld [vmem:[%s3212_s5 + $0x4] sm:$0xf] }
 0x52e   :  { %v1165_v25 = vpop.f32.mrb[30].mxu1  ;;  %2353 = vmatmul.mubr.msk.bf16.vlgmr.msra.gmra.mrb[44].mxu0 %vm169_vm2, %v1402_v4  ;;  %v1862_v33 = vsel %vm855_vm3, %v1798_v32, 0 }
 0x52f   :  { %v1395_v26 = vadd.f32 %v1387_v56, %v1299_v60  ;;  %v2313_v6 = vpop.f32.mrb[31].mxu1  ;;  %2363 = vmatpush3.bf16.msra.mxu0 %v1747_v22  ;;  %v1207_v45 = vpop.f32.mrb[32].mxu0  ;;  %2364 = vmatprep.mubr.msk.bf16.mxu0 %vm2536_vm0, %v2535_v1 }
 0x530   :  { %v1388_v7 = vmul.f32 %v3107_v21, %v1207_v45  ;;  %v2318_v27 = vpop.f32.mrb[33].mxu0  ;;  %2374 = vmatprep.subr.bf16.mxu0 %v2535_v1 }
 0x531   :  { %v1403_v28 = vpack.c.bf16 %v1395_v26, %v1395_v26  ;;  %v1210_v46 = vpop.f32.mrb[34].mxu0 }
 0x532   :  { %v1396_v8 = vadd.f32 %v1388_v7, %v1300_v39  ;;  %v2319_v30 = vpop.f32.mrb[35].mxu0 }
 0x533   :  { %2359 = vmatmul.mubr.msk.bf16.vlgmr.msra.gmra.mrb[44].mxu1 %vm169_vm2, %v1403_v28 }
 0x534   :  { %v1404_v11 = vpack.c.bf16 %v1396_v8, %v1396_v8  ;;  %2370 = vmatprep.mubr.msk.bf16.mxu1 %vm2536_vm0, %v2535_v1  ;;  %2369 = vmatpush3.bf16.msra.mxu1 %v1810_v57 }
 0x535   :  { %2380 = vmatprep.subr.bf16.mxu1 %v2535_v1 }
 0x536   :  { %2365 = vmatmul.mubr.msk.bf16.vlgmr.msra.gmra.mrb[48].mxu0 %vm169_vm2, %v1404_v11 }
 0x537   :  { %2376 = vmatprep.mubr.msk.bf16.mxu0 %vm2536_vm0, %v2535_v1  ;;  %2375 = vmatpush3.bf16.msra.mxu0 %v1862_v33 }
 0x538   :  { %2386 = vmatprep.subr.bf16.mxu0 %v2535_v1 }
 0x5ee   :  { %v1447_v34 = vpop.f32.mrb[32].mxu1 }
 0x5ef   :  { %v2324_v63 = vpop.f32.mrb[33].mxu1 }
 0x5f0   :  { %v1450_v61 = vpop.f32.mrb[34].mxu1 }
 0x5f1   :  { %v2325_v21 = vpop.f32.mrb[35].mxu1  ;;  %v1495_v29 = vpop.f32.mrb[36].mxu0 }
 0x5f2   :  { %v2153_v18 = vpack.c.bf16 %v1495_v29, %v1447_v34  ;;  %v2330_v37 = vpop.f32.mrb[37].mxu0  ;;  %v2150_v34 = vld [vmem:[%s3213_s6] ss:$0 sm:$0xff] }
 0x5f3   :  { %v1498_v55 = vpop.f32.mrb[38].mxu0 }
 0x5f4   :  { %v2331_v62 = vpop.f32.mrb[39].mxu0  ;;  %2371 = vmatmul.mubr.msk.bf16.vlgmr.msra.gmra.mrb[48].mxu1 %vm169_vm2, %v2153_v18 }
 0x5f5   :  { %2381 = vmatpush3.bf16.msra.mxu1 %v1914_v12  ;;  %2382 = vmatprep.mubr.msk.bf16.mxu1 %vm2536_vm0, %v2535_v1 }
 0x5f6   :  { %v1543_v38 = vpop.f32.mrb[36].mxu1 }
 0x5f7   :  { %v2336_v58 = vpop.f32.mrb[37].mxu1 }
 0x5f8   :  { %v1546_v31 = vpop.f32.mrb[38].mxu1 }
 0x5f9   :  { %v2337_v53 = vpop.f32.mrb[39].mxu1  ;;  %v1591_v2 = vpop.f32.mrb[40].mxu0 }
 0x5fa   :  { %v2154_v3 = vpack.c.bf16 %v1591_v2, %v1543_v38  ;;  %v2342_v10 = vpop.f32.mrb[41].mxu0 }
 0x5fb   :  { %v1594_v47 = vpop.f32.mrb[42].mxu0 }
 0x5fc   :  { %v2343_v17 = vpop.f32.mrb[43].mxu0  ;;  %2377 = vmatmul.mubr.msk.bf16.vlgmr.msra.gmra.mrb[52].mxu0 %vm169_vm2, %v2154_v3 }
 0x5fd   :  { %2387 = vmatpush3.bf16.msra.mxu0 %v1966_v9  ;;  %2388 = vmatprep.mubr.msk.bf16.mxu0 %vm2536_vm0, %v2535_v1 }
 0x5fe   :  { %v1639_v20 = vpop.f32.mrb[40].mxu1 }
 0x5ff   :  { %v2348_v15 = vpop.f32.mrb[41].mxu1 }
 0x600   :  { %v1642_v16 = vpop.f32.mrb[42].mxu1 }
 0x601   :  { %v2349_v19 = vpop.f32.mrb[43].mxu1  ;;  %v1687_v13 = vpop.f32.mrb[44].mxu0 }
 0x602   :  { %v2155_v23 = vpack.c.bf16 %v1687_v13, %v1639_v20  ;;  %v2354_v41 = vpop.f32.mrb[45].mxu0 }
 0x603   :  { %v1690_v42 = vpop.f32.mrb[46].mxu0 }
 0x604   :  { %v2355_v24 = vpop.f32.mrb[47].mxu0  ;;  %2383 = vmatmul.mubr.msk.bf16.vlgmr.msra.gmra.mrb[52].mxu1 %vm169_vm2, %v2155_v23 }
 0x606   :  { %v1735_v43 = vpop.f32.mrb[44].mxu1 }
 0x607   :  { %v2360_v36 = vpop.f32.mrb[45].mxu1 }
 0x608   :  { %v1738_v44 = vpop.f32.mrb[46].mxu1 }
 0x609   :  { %v2361_v48 = vpop.f32.mrb[47].mxu1  ;;  %v1783_v49 = vpop.f32.mrb[48].mxu0 }
 0x60a   :  { %v2156_v50 = vpack.c.bf16 %v1783_v49, %v1735_v43  ;;  %v2366_v52 = vpop.f32.mrb[49].mxu0 }
 0x60b   :  { %v1786_v54 = vpop.f32.mrb[50].mxu0 }
 0x60c   :  { %v2367_v1 = vpop.f32.mrb[51].mxu0  ;;  %2389 = vmatmul.mubr.msk.bf16.vlgmr.msra.gmra.mrb[56].mxu0 %vm169_vm2, %v2156_v50 }
 0x6c7   :  { %v1846_v51 = vpop.f32.mrb[48].mxu1 }
 0x6c8   :  { %v2372_v0 = vpop.f32.mrb[49].mxu1  ;;  %v2009_v56 = vsel %vm104_vm1, %v1846_v51, 0.0 }
 0x6c9   :  { %v1849_v4 = vpop.f32.mrb[50].mxu1 }
 0x6ca   :  { %v2373_v14 = vpop.f32.mrb[51].mxu1  ;;  %v2016_v6 = vsel %vm104_vm1, %v1849_v4, 0.0 }
 0x6cf   :  { %v1898_v60 = vpop.f32.mrb[52].mxu0 }
 0x6d0   :  { %v2010_v59 = vsel %vm104_vm1, %v1898_v60, 0.0  ;;  %v2378_v22 = vpop.f32.mrb[53].mxu0 }
 0x6d1   :  { %v2011_v25 = vadd.f32 %v2010_v59, %v2009_v56  ;;  %v1901_v26 = vpop.f32.mrb[54].mxu0 }
 0x6d2   :  { %v2017_v45 = vsel %vm104_vm1, %v1901_v26, 0.0  ;;  %v2379_v39 = vpop.f32.mrb[55].mxu0 }
 0x6d3   :  { %v2018_v7 = vadd.f32 %v2017_v45, %v2016_v6 }
 0x6d7   :  { %v1950_v27 = vpop.f32.mrb[52].mxu1 }
 0x6d8   :  { %v2012_v28 = vsel %vm104_vm1, %v1950_v27, 0.0  ;;  %v2384_v46 = vpop.f32.mrb[53].mxu1 }
 0x6d9   :  { %v2013_v8 = vadd.f32 %v2012_v28, %v2011_v25  ;;  %v1953_v30 = vpop.f32.mrb[54].mxu1 }
 0x6da   :  { %v2019_v11 = vsel %vm104_vm1, %v1953_v30, 0.0  ;;  %v2385_v40 = vpop.f32.mrb[55].mxu1 }
 0x6db   :  { %v2020_v57 = vadd.f32 %v2019_v11, %v2018_v7 }
 0x6df   :  { %v2002_v32 = vpop.f32.mrb[56].mxu0 }
 0x6e0   :  { %v2014_v33 = vsel %vm104_vm1, %v2002_v32, 0.0  ;;  %v2390_v63 = vpop.f32.mrb[57].mxu0 }
 0x6e1   :  { %v2015_v35 = vadd.f32 %v2014_v33, %v2013_v8  ;;  %v2005_v61 = vpop.f32.mrb[58].mxu0 }
 0x6e2   :  { %v2021_v21 = vsel %vm104_vm1, %v2005_v61, 0.0  ;;  %v2391_v29 = vpop.f32.mrb[59].mxu0 }
 0x6e3   :  { %v2030_v18 = vadd.f32 %v2150_v34, %v2015_v35  ;;  %v2022_v37 = vadd.f32 %v2021_v21, %v2020_v57 }
 0x6e5   :  { %v2031_v12 = vadd.f32 %v2150_v34, %v2022_v37  ;;  %v2032_v55 = vpack.c.bf16 %v2030_v18, %v2030_v18 }
 0x6e7   :  { %v2033_v62 = vpack.c.bf16 %v2031_v12, %v2031_v12  ;;  %2035 = vst.msk [vmem:[#allocation11] sm:$0xf] %vm2034_vm4, %v2032_v55 }
 0x6e9   :  { %2036 = vst.msk [vmem:[#allocation11 + $0x4] sm:$0xf] %vm2034_vm4, %v2033_v62 }
 0x6ea   :  { %2508 = shalt.err (!%p2505_p9)
}
 0x6eb   :  { %s2509_s13 = scalar_lea.hbm %s3216_s9, 128 }
 0x6ec   :  { %p2510_p10 = scmp.ne.s32.totalorder %s3216_s9, %s2509_s13  ;;  %p2513_p11 = scmp.lt.u32.totalorder %s2509_s13, %s3216_s9 }
 0x6ee   :  { %p2515_p12 = pnand %p2513_p11, %p2510_p10 }
 0x6f0   :  { %2518 = shalt.err (!%p2515_p12)
}
 0x6f1   :  { %2048 = dma.vmem_to_hbm [thread:$0]  %s2043_s10, 128, %s3216_s9, [#allocation4], %s2533_s20, %s2533_s20, %s2534_s21  }
 0x6f2   :  { %2527 = dma.done.wait [#allocation4], 128  }
 0x6f3   :  { %2528 = vsyncadd [#allocation4], 4294967168 }
 0x6f4   :  { %2052 = vsyncpa [#allocation3], 1 }
 0x6f5   :  { %2053 = vsyncpa [#allocation4], 1 }
 0x6f6   :  { %2054 = vsyncpa [#allocation5], 1 }
 0x6f7   :  { %2055 = vsyncpa [#allocation8], 1 }
 0x6f8   :  { %2056 = vsyncpa [#allocation6], 1 }

</bundles_post_ra>
